<compile_context>
chip_gen: v7x
topology: tpu7x:2x2x1
jax: 0.10.0
libtpu: 0.0.40
codegen_flags: <defaults>
</compile_context>

<pallas_src>
import functools

import jax
import jax.numpy as jnp
from jax.experimental import pallas as pl
from jax.experimental.pallas import tpu as pltpu

LANE = 128  # pad every channel dim to one full lane width


# --------------------------- Fused forward kernel ----------------------------
# One grid step == one graph.  refs layout:
#   [a, f, prot,  (w,b) * num_gcn,  w1g,b1g,w2g,b2g,wo1c,wo1p,bo1,wo2,bo2,wo3,bo3,
#    z_out, comp_out]
def _fused_forward_kernel(num_gcn, *refs):
    n_in = 3 + 2 * num_gcn + 11
    a_ref, f_ref, prot_ref = refs[0], refs[1], refs[2]
    gcn_refs = refs[3:3 + 2 * num_gcn]
    (w1g, b1g, w2g, b2g, wo1c, wo1p, bo1,
     wo2, bo2, wo3, bo3) = refs[3 + 2 * num_gcn:n_in]
    z_ref, comp_ref = refs[n_in], refs[n_in + 1]

    a = a_ref[0]                                  # (N, N)   bf16
    h_bf = f_ref[0]                               # (N, 128) bf16
    h_f32 = h_bf.astype(jnp.float32)

    # GCN stack: h' = relu(A_hat @ h @ W + b), bf16 MXU operands, f32 accum.
    for layer in range(num_gcn):
        w = gcn_refs[2 * layer][...]              # (128, 128) bf16
        b = gcn_refs[2 * layer + 1][...]          # (1, 128)   f32
        ah = jnp.dot(a, h_bf, preferred_element_type=jnp.float32)
        z = jnp.dot(ah.astype(jnp.bfloat16), w,
                    preferred_element_type=jnp.float32) + b
        h_f32 = jnp.maximum(z, 0.0)
        h_bf = h_f32.astype(jnp.bfloat16)

    # dgl MaxPooling: max over this graph's nodes (sublane reduce -> XLU).
    pooled = jnp.max(h_f32, axis=0, keepdims=True)          # (1, 128) f32

    def lin(x_f32, w_ref, b_ref):
        return jnp.dot(x_f32.astype(jnp.bfloat16), w_ref[...],
                       preferred_element_type=jnp.float32) + b_ref[...]

    h = jnp.maximum(lin(pooled, w1g, b1g), 0.0)              # fc1_graph + relu
    comp = lin(h, w2g, b2g)                                  # fc2_graph
    comp_ref[0] = comp

    # W_out1(cat(comp, prot)) == comp @ Wc + prot @ Wp + b   (split, no concat)
    y = (jnp.dot(comp.astype(jnp.bfloat16), wo1c[...],
                 preferred_element_type=jnp.float32)
         + jnp.dot(prot_ref[0], wo1p[...],
                   preferred_element_type=jnp.float32)
         + bo1[...])
    y = jnp.maximum(y, 0.0)
    y = jnp.maximum(lin(y, wo2, bo2), 0.0)                   # W_out2 + relu
    z_ref[0] = lin(y, wo3, bo3)                              # W_out3


# ------------------------------- Wrapper --------------------------------------
def mol_gnn2_forward(a_hat, f, prot_bat, params):
    B, N, in_dim = f.shape
    num_gcn = len(params["gcn"])
    num_classes = params["bo3"].shape[-1]
    prot_dim = params["b2g"].shape[-1]

    # ---- lane-pad everything to 128 and cast MXU operands to bf16 -----------
    def pw(w):  # weight (cin, cout) -> (128, 128) bf16 (zero pad)
        return jnp.pad(
            w, ((0, LANE - w.shape[0]), (0, LANE - w.shape[1]))
        ).astype(jnp.bfloat16)

    def pb(b):  # bias (1, cout) -> (1, 128) f32 (zero pad)
        return jnp.pad(b, ((0, 0), (0, LANE - b.shape[1]))).astype(jnp.float32)

    a_bf = a_hat.astype(jnp.bfloat16)
    f_pad = jnp.pad(f, ((0, 0), (0, 0), (0, LANE - in_dim))).astype(jnp.bfloat16)
    prot_pad = jnp.pad(
        prot_bat, ((0, 0), (0, LANE - prot_bat.shape[1]))
    ).astype(jnp.bfloat16).reshape(B, 1, LANE)

    gcn_flat = []
    for (w, b) in params["gcn"]:
        gcn_flat += [pw(w), pb(b)]
    head_flat = [pw(params["w1g"]), pb(params["b1g"]),
                 pw(params["w2g"]), pb(params["b2g"]),
                 pw(params["wo1c"]), pw(params["wo1p"]), pb(params["bo1"]),
                 pw(params["wo2"]), pb(params["bo2"]),
                 pw(params["wo3"]), pb(params["bo3"])]

    # ---- block specs ---------------------------------------------------------
    w_spec = pl.BlockSpec((LANE, LANE), lambda g: (0, 0))
    b_spec = pl.BlockSpec((1, LANE), lambda g: (0, 0))
    in_specs = [
        pl.BlockSpec((1, N, N), lambda g: (g, 0, 0)),      # A_hat[g]
        pl.BlockSpec((1, N, LANE), lambda g: (g, 0, 0)),   # features[g]
        pl.BlockSpec((1, 1, LANE), lambda g: (g, 0, 0)),   # prot[g]
    ]
    in_specs += [w_spec, b_spec] * num_gcn
    in_specs += [w_spec, b_spec, w_spec, b_spec,
                 w_spec, w_spec, b_spec,
                 w_spec, b_spec, w_spec, b_spec]

    row_out = pl.BlockSpec((1, 1, LANE), lambda g: (g, 0, 0))

    z_pad, comp_pad = pl.pallas_call(
        functools.partial(_fused_forward_kernel, num_gcn),
        out_shape=(jax.ShapeDtypeStruct((B, 1, LANE), jnp.float32),
                   jax.ShapeDtypeStruct((B, 1, LANE), jnp.float32)),
        grid_spec=pltpu.PrefetchScalarGridSpec(
            num_scalar_prefetch=0,
            grid=(B,),
            in_specs=in_specs,
            out_specs=[row_out, row_out],
        ),
        compiler_params=pltpu.CompilerParams(
            dimension_semantics=("parallel",)),
    )(a_bf, f_pad, prot_pad, *gcn_flat, *head_flat)

    z_interaction = z_pad[:, 0, :num_classes]
    comp = comp_pad[:, 0, :prot_dim]
    prot_bat_final = prot_bat            # cross_attention is identity
    return z_interaction, comp, prot_bat_final


# ------------------------------ Reference ------------------------------------
def mol_gnn2_reference(a_hat, f, prot_bat, params):
    h = f
    for (w, b) in params["gcn"]:
        h = jax.nn.relu(jnp.einsum("bij,bjc->bic", a_hat, h) @ w + b)
    comp_pooled = h.max(axis=1)
    hh = jax.nn.relu(comp_pooled @ params["w1g"] + params["b1g"])
    comp = hh @ params["w2g"] + params["b2g"]
    y = jnp.concatenate([comp, prot_bat], axis=1)
    wo1 = jnp.concatenate([params["wo1c"], params["wo1p"]], axis=0)
    hh = jax.nn.relu(y @ wo1 + params["bo1"])
    hh = jax.nn.relu(hh @ params["wo2"] + params["bo2"])
    z = hh @ params["wo3"] + params["bo3"]
    return z, comp, prot_bat


# ------------------------------ Setup -----------------------------------------
def make_params(key, in_dim, gnn_channels, gnn_hidden, prot_dim, num_classes):
    ks = iter(jax.random.split(key, 32))

    def lin(cin, cout):
        w = 0.1 * jax.random.normal(next(ks), (cin, cout), jnp.float32)
        b = 0.1 * jax.random.normal(next(ks), (1, cout), jnp.float32)
        return w, b

    gcn = []
    cin = in_dim
    for cout in gnn_channels:
        gcn.append(lin(cin, cout))
        cin = cout

    c_last = gnn_channels[-1]
    h2 = gnn_hidden * 2
    w1g, b1g = lin(c_last, h2)               # fc1_graph
    w2g, b2g = lin(h2, prot_dim)             # fc2_graph
    wo1, bo1 = lin(2 * prot_dim, h2)         # W_out1 (split below)
    wo2, bo2 = lin(h2, gnn_hidden)           # W_out2
    wo3, bo3 = lin(gnn_hidden, num_classes)  # W_out3
    return dict(gcn=gcn,
                w1g=w1g, b1g=b1g, w2g=w2g, b2g=b2g,
                wo1c=wo1[:prot_dim], wo1p=wo1[prot_dim:], bo1=bo1,
                wo2=wo2, bo2=bo2, wo3=wo3, bo3=bo3)


def make_adjacency(key, B, N):
    a = (jax.random.uniform(key, (B, N, N)) > 0.5).astype(jnp.float32)
    a = jnp.maximum(a, jnp.transpose(a, (0, 2, 1)))                  # symmetric
    a = jnp.minimum(a + jnp.eye(N, dtype=jnp.float32)[None], 1.0)    # self-loops
    dinv = 1.0 / jnp.sqrt(a.sum(-1))
    return a * dinv[:, :, None] * dinv[:, None, :]                   # D^-1/2 (A+I) D^-1/2


if __name__ == "__main__":
    key = jax.random.PRNGKey(0)
    k_adj, k_feat, k_prot, k_par = jax.random.split(key, 4)

    B, N = 2, 8
    in_dim = 16
    gnn_channels = [32, 32]
    gnn_hidden = 16
    prot_dim = 32
    num_classes = 2

    a_hat = make_adjacency(k_adj, B, N)
    f = jax.random.normal(k_feat, (B, N, in_dim), jnp.float32)
    prot_bat = jax.random.normal(k_prot, (B, prot_dim), jnp.float32)
    params = make_params(k_par, in_dim, gnn_channels, gnn_hidden,
                         prot_dim, num_classes)

    z, comp, prot_final = mol_gnn2_forward(a_hat, f, prot_bat, params)
    jax.block_until_ready((z, comp, prot_final))

    z_r, comp_r, prot_r = mol_gnn2_reference(a_hat, f, prot_bat, params)
    assert z.shape == (B, num_classes) and comp.shape == (B, prot_dim)
    assert jnp.allclose(z, z_r, rtol=2e-2, atol=2e-2)
    assert jnp.allclose(comp, comp_r, rtol=2e-2, atol=2e-2)
    assert jnp.allclose(prot_final, prot_r)

    print("KERNEL_OK")
</pallas_src>

<mosaic_0001>
module attributes {stable_mosaic.version = 11 : i64} {
  func.func @_fused_forward_kernel(%arg0: i32, %arg1: memref<1x8x8xbf16, #tpu.memory_space<vmem>>, %arg2: memref<1x8x128xbf16, #tpu.memory_space<vmem>>, %arg3: memref<1x1x128xbf16, #tpu.memory_space<vmem>>, %arg4: memref<128x128xbf16, #tpu.memory_space<vmem>>, %arg5: memref<1x128xf32, #tpu.memory_space<vmem>>, %arg6: memref<128x128xbf16, #tpu.memory_space<vmem>>, %arg7: memref<1x128xf32, #tpu.memory_space<vmem>>, %arg8: memref<128x128xbf16, #tpu.memory_space<vmem>>, %arg9: memref<1x128xf32, #tpu.memory_space<vmem>>, %arg10: memref<128x128xbf16, #tpu.memory_space<vmem>>, %arg11: memref<1x128xf32, #tpu.memory_space<vmem>>, %arg12: memref<128x128xbf16, #tpu.memory_space<vmem>>, %arg13: memref<128x128xbf16, #tpu.memory_space<vmem>>, %arg14: memref<1x128xf32, #tpu.memory_space<vmem>>, %arg15: memref<128x128xbf16, #tpu.memory_space<vmem>>, %arg16: memref<1x128xf32, #tpu.memory_space<vmem>>, %arg17: memref<128x128xbf16, #tpu.memory_space<vmem>>, %arg18: memref<1x128xf32, #tpu.memory_space<vmem>>, %arg19: memref<1x1x128xf32, #tpu.memory_space<vmem>>, %arg20: memref<1x1x128xf32, #tpu.memory_space<vmem>>) attributes {dimension_semantics = [#tpu.dimension_semantics<parallel>], iteration_bounds = array<i64: 2>, scalar_prefetch = 0 : i64, scratch_operands = 0 : i64, tpu.core_type = #tpu.core_type<tc>, window_params = [{transform_indices = @transform_0, window_bounds = array<i64: 1, 8, 8>}, {transform_indices = @transform_1, window_bounds = array<i64: 1, 8, 128>}, {transform_indices = @transform_2, window_bounds = array<i64: 1, 1, 128>}, {pipeline_mode = #tpu.pipeline_mode<synchronous>, transform_indices = @transform_3, window_bounds = array<i64: 128, 128>}, {pipeline_mode = #tpu.pipeline_mode<synchronous>, transform_indices = @transform_4, window_bounds = array<i64: 1, 128>}, {pipeline_mode = #tpu.pipeline_mode<synchronous>, transform_indices = @transform_5, window_bounds = array<i64: 128, 128>}, {pipeline_mode = #tpu.pipeline_mode<synchronous>, transform_indices = @transform_6, window_bounds = array<i64: 1, 128>}, {pipeline_mode = #tpu.pipeline_mode<synchronous>, transform_indices = @transform_7, window_bounds = array<i64: 128, 128>}, {pipeline_mode = #tpu.pipeline_mode<synchronous>, transform_indices = @transform_8, window_bounds = array<i64: 1, 128>}, {pipeline_mode = #tpu.pipeline_mode<synchronous>, transform_indices = @transform_9, window_bounds = array<i64: 128, 128>}, {pipeline_mode = #tpu.pipeline_mode<synchronous>, transform_indices = @transform_10, window_bounds = array<i64: 1, 128>}, {pipeline_mode = #tpu.pipeline_mode<synchronous>, transform_indices = @transform_11, window_bounds = array<i64: 128, 128>}, {pipeline_mode = #tpu.pipeline_mode<synchronous>, transform_indices = @transform_12, window_bounds = array<i64: 128, 128>}, {pipeline_mode = #tpu.pipeline_mode<synchronous>, transform_indices = @transform_13, window_bounds = array<i64: 1, 128>}, {pipeline_mode = #tpu.pipeline_mode<synchronous>, transform_indices = @transform_14, window_bounds = array<i64: 128, 128>}, {pipeline_mode = #tpu.pipeline_mode<synchronous>, transform_indices = @transform_15, window_bounds = array<i64: 1, 128>}, {pipeline_mode = #tpu.pipeline_mode<synchronous>, transform_indices = @transform_16, window_bounds = array<i64: 128, 128>}, {pipeline_mode = #tpu.pipeline_mode<synchronous>, transform_indices = @transform_17, window_bounds = array<i64: 1, 128>}, {transform_indices = @transform_18, window_bounds = array<i64: 1, 1, 128>}, {transform_indices = @transform_19, window_bounds = array<i64: 1, 1, 128>}]} {
    %c0 = arith.constant 0 : index
    %c0_0 = arith.constant 0 : index
    %c0_1 = arith.constant 0 : index
    %0 = vector.load %arg1[%c0, %c0_0, %c0_1] : memref<1x8x8xbf16, #tpu.memory_space<vmem>>, vector<1x8x8xbf16>
    %1 = vector.shape_cast %0 : vector<1x8x8xbf16> to vector<8x8xbf16>
    %c0_2 = arith.constant 0 : index
    %c0_3 = arith.constant 0 : index
    %c0_4 = arith.constant 0 : index
    %2 = vector.load %arg2[%c0_2, %c0_3, %c0_4] : memref<1x8x128xbf16, #tpu.memory_space<vmem>>, vector<1x8x128xbf16>
    %3 = vector.shape_cast %2 : vector<1x8x128xbf16> to vector<8x128xbf16>
    %c0_5 = arith.constant 0 : index
    %c0_6 = arith.constant 0 : index
    %4 = vector.load %arg4[%c0_5, %c0_6] : memref<128x128xbf16, #tpu.memory_space<vmem>>, vector<128x128xbf16>
    %c0_7 = arith.constant 0 : index
    %c0_8 = arith.constant 0 : index
    %5 = vector.load %arg5[%c0_7, %c0_8] : memref<1x128xf32, #tpu.memory_space<vmem>>, vector<1x128xf32>
    %cst = arith.constant dense<0.000000e+00> : vector<8x128xf32>
    %6 = tpu.matmul %1, %3, %cst {dimension_numbers = #tpu.dot_dimension_numbers<[1], [0], [0], [1], [0, 0, 1, 1], [], []>} : vector<8x8xbf16>, vector<8x128xbf16>, vector<8x128xf32> -> vector<8x128xf32>
    %7 = arith.truncf %6 : vector<8x128xf32> to vector<8x128xbf16>
    %cst_9 = arith.constant dense<0.000000e+00> : vector<8x128xf32>
    %8 = tpu.matmul %7, %4, %cst_9 {dimension_numbers = #tpu.dot_dimension_numbers<[1], [0], [0], [1], [0, 0, 1, 1], [], []>} : vector<8x128xbf16>, vector<128x128xbf16>, vector<8x128xf32> -> vector<8x128xf32>
    %9 = vector.broadcast %5 : vector<1x128xf32> to vector<8x128xf32>
    %10 = arith.addf %8, %9 : vector<8x128xf32>
    %cst_10 = arith.constant 0.000000e+00 : f32
    %11 = vector.broadcast %cst_10 : f32 to vector<8x128xf32>
    %12 = arith.maximumf %10, %11 : vector<8x128xf32>
    %13 = arith.truncf %12 : vector<8x128xf32> to vector<8x128xbf16>
    %c0_11 = arith.constant 0 : index
    %c0_12 = arith.constant 0 : index
    %14 = vector.load %arg6[%c0_11, %c0_12] : memref<128x128xbf16, #tpu.memory_space<vmem>>, vector<128x128xbf16>
    %c0_13 = arith.constant 0 : index
    %c0_14 = arith.constant 0 : index
    %15 = vector.load %arg7[%c0_13, %c0_14] : memref<1x128xf32, #tpu.memory_space<vmem>>, vector<1x128xf32>
    %cst_15 = arith.constant dense<0.000000e+00> : vector<8x128xf32>
    %16 = tpu.matmul %1, %13, %cst_15 {dimension_numbers = #tpu.dot_dimension_numbers<[1], [0], [0], [1], [0, 0, 1, 1], [], []>} : vector<8x8xbf16>, vector<8x128xbf16>, vector<8x128xf32> -> vector<8x128xf32>
    %17 = arith.truncf %16 : vector<8x128xf32> to vector<8x128xbf16>
    %cst_16 = arith.constant dense<0.000000e+00> : vector<8x128xf32>
    %18 = tpu.matmul %17, %14, %cst_16 {dimension_numbers = #tpu.dot_dimension_numbers<[1], [0], [0], [1], [0, 0, 1, 1], [], []>} : vector<8x128xbf16>, vector<128x128xbf16>, vector<8x128xf32> -> vector<8x128xf32>
    %19 = vector.broadcast %15 : vector<1x128xf32> to vector<8x128xf32>
    %20 = arith.addf %18, %19 : vector<8x128xf32>
    %cst_17 = arith.constant 0.000000e+00 : f32
    %21 = vector.broadcast %cst_17 : f32 to vector<8x128xf32>
    %22 = arith.maximumf %20, %21 : vector<8x128xf32>
    %cst_18 = arith.constant dense<0xFF800000> : vector<128xf32>
    %23 = vector.multi_reduction <maximumf>, %22, %cst_18 [0] : vector<8x128xf32> to vector<128xf32>
    %24 = vector.shape_cast %23 : vector<128xf32> to vector<1x128xf32>
    %25 = arith.truncf %24 : vector<1x128xf32> to vector<1x128xbf16>
    %c0_19 = arith.constant 0 : index
    %c0_20 = arith.constant 0 : index
    %26 = vector.load %arg8[%c0_19, %c0_20] : memref<128x128xbf16, #tpu.memory_space<vmem>>, vector<128x128xbf16>
    %cst_21 = arith.constant dense<0.000000e+00> : vector<1x128xf32>
    %27 = tpu.matmul %25, %26, %cst_21 {dimension_numbers = #tpu.dot_dimension_numbers<[1], [0], [0], [1], [0, 0, 1, 1], [], []>} : vector<1x128xbf16>, vector<128x128xbf16>, vector<1x128xf32> -> vector<1x128xf32>
    %c0_22 = arith.constant 0 : index
    %c0_23 = arith.constant 0 : index
    %28 = vector.load %arg9[%c0_22, %c0_23] : memref<1x128xf32, #tpu.memory_space<vmem>>, vector<1x128xf32>
    %29 = arith.addf %27, %28 : vector<1x128xf32>
    %cst_24 = arith.constant 0.000000e+00 : f32
    %30 = vector.broadcast %cst_24 : f32 to vector<1x128xf32>
    %31 = arith.maximumf %29, %30 : vector<1x128xf32>
    %32 = arith.truncf %31 : vector<1x128xf32> to vector<1x128xbf16>
    %c0_25 = arith.constant 0 : index
    %c0_26 = arith.constant 0 : index
    %33 = vector.load %arg10[%c0_25, %c0_26] : memref<128x128xbf16, #tpu.memory_space<vmem>>, vector<128x128xbf16>
    %cst_27 = arith.constant dense<0.000000e+00> : vector<1x128xf32>
    %34 = tpu.matmul %32, %33, %cst_27 {dimension_numbers = #tpu.dot_dimension_numbers<[1], [0], [0], [1], [0, 0, 1, 1], [], []>} : vector<1x128xbf16>, vector<128x128xbf16>, vector<1x128xf32> -> vector<1x128xf32>
    %c0_28 = arith.constant 0 : index
    %c0_29 = arith.constant 0 : index
    %35 = vector.load %arg11[%c0_28, %c0_29] : memref<1x128xf32, #tpu.memory_space<vmem>>, vector<1x128xf32>
    %36 = arith.addf %34, %35 : vector<1x128xf32>
    %c0_30 = arith.constant 0 : index
    %c0_31 = arith.constant 0 : index
    %c0_32 = arith.constant 0 : index
    %37 = vector.load %arg20[%c0_30, %c0_31, %c0_32] : memref<1x1x128xf32, #tpu.memory_space<vmem>>, vector<1x1x128xf32>
    %38 = vector.shape_cast %37 : vector<1x1x128xf32> to vector<1x128xf32>
    %39 = vector.shape_cast %36 : vector<1x128xf32> to vector<1x1x128xf32>
    tpu.vector_store %arg20[%c0_30, %c0_31, %c0_32], %39 {strides = array<i32>} : memref<1x1x128xf32, #tpu.memory_space<vmem>>, vector<1x1x128xf32>,
    %40 = arith.truncf %36 : vector<1x128xf32> to vector<1x128xbf16>
    %c0_33 = arith.constant 0 : index
    %c0_34 = arith.constant 0 : index
    %41 = vector.load %arg12[%c0_33, %c0_34] : memref<128x128xbf16, #tpu.memory_space<vmem>>, vector<128x128xbf16>
    %cst_35 = arith.constant dense<0.000000e+00> : vector<1x128xf32>
    %42 = tpu.matmul %40, %41, %cst_35 {dimension_numbers = #tpu.dot_dimension_numbers<[1], [0], [0], [1], [0, 0, 1, 1], [], []>} : vector<1x128xbf16>, vector<128x128xbf16>, vector<1x128xf32> -> vector<1x128xf32>
    %c0_36 = arith.constant 0 : index
    %c0_37 = arith.constant 0 : index
    %c0_38 = arith.constant 0 : index
    %43 = vector.load %arg3[%c0_36, %c0_37, %c0_38] : memref<1x1x128xbf16, #tpu.memory_space<vmem>>, vector<1x1x128xbf16>
    %44 = vector.shape_cast %43 : vector<1x1x128xbf16> to vector<1x128xbf16>
    %c0_39 = arith.constant 0 : index
    %c0_40 = arith.constant 0 : index
    %45 = vector.load %arg13[%c0_39, %c0_40] : memref<128x128xbf16, #tpu.memory_space<vmem>>, vector<128x128xbf16>
    %cst_41 = arith.constant dense<0.000000e+00> : vector<1x128xf32>
    %46 = tpu.matmul %44, %45, %cst_41 {dimension_numbers = #tpu.dot_dimension_numbers<[1], [0], [0], [1], [0, 0, 1, 1], [], []>} : vector<1x128xbf16>, vector<128x128xbf16>, vector<1x128xf32> -> vector<1x128xf32>
    %47 = arith.addf %42, %46 : vector<1x128xf32>
    %c0_42 = arith.constant 0 : index
    %c0_43 = arith.constant 0 : index
    %48 = vector.load %arg14[%c0_42, %c0_43] : memref<1x128xf32, #tpu.memory_space<vmem>>, vector<1x128xf32>
    %49 = arith.addf %47, %48 : vector<1x128xf32>
    %cst_44 = arith.constant 0.000000e+00 : f32
    %50 = vector.broadcast %cst_44 : f32 to vector<1x128xf32>
    %51 = arith.maximumf %49, %50 : vector<1x128xf32>
    %52 = arith.truncf %51 : vector<1x128xf32> to vector<1x128xbf16>
    %c0_45 = arith.constant 0 : index
    %c0_46 = arith.constant 0 : index
    %53 = vector.load %arg15[%c0_45, %c0_46] : memref<128x128xbf16, #tpu.memory_space<vmem>>, vector<128x128xbf16>
    %cst_47 = arith.constant dense<0.000000e+00> : vector<1x128xf32>
    %54 = tpu.matmul %52, %53, %cst_47 {dimension_numbers = #tpu.dot_dimension_numbers<[1], [0], [0], [1], [0, 0, 1, 1], [], []>} : vector<1x128xbf16>, vector<128x128xbf16>, vector<1x128xf32> -> vector<1x128xf32>
    %c0_48 = arith.constant 0 : index
    %c0_49 = arith.constant 0 : index
    %55 = vector.load %arg16[%c0_48, %c0_49] : memref<1x128xf32, #tpu.memory_space<vmem>>, vector<1x128xf32>
    %56 = arith.addf %54, %55 : vector<1x128xf32>
    %cst_50 = arith.constant 0.000000e+00 : f32
    %57 = vector.broadcast %cst_50 : f32 to vector<1x128xf32>
    %58 = arith.maximumf %56, %57 : vector<1x128xf32>
    %59 = arith.truncf %58 : vector<1x128xf32> to vector<1x128xbf16>
    %c0_51 = arith.constant 0 : index
    %c0_52 = arith.constant 0 : index
    %60 = vector.load %arg17[%c0_51, %c0_52] : memref<128x128xbf16, #tpu.memory_space<vmem>>, vector<128x128xbf16>
    %cst_53 = arith.constant dense<0.000000e+00> : vector<1x128xf32>
    %61 = tpu.matmul %59, %60, %cst_53 {dimension_numbers = #tpu.dot_dimension_numbers<[1], [0], [0], [1], [0, 0, 1, 1], [], []>} : vector<1x128xbf16>, vector<128x128xbf16>, vector<1x128xf32> -> vector<1x128xf32>
    %c0_54 = arith.constant 0 : index
    %c0_55 = arith.constant 0 : index
    %62 = vector.load %arg18[%c0_54, %c0_55] : memref<1x128xf32, #tpu.memory_space<vmem>>, vector<1x128xf32>
    %63 = arith.addf %61, %62 : vector<1x128xf32>
    %c0_56 = arith.constant 0 : index
    %c0_57 = arith.constant 0 : index
    %c0_58 = arith.constant 0 : index
    %64 = vector.load %arg19[%c0_56, %c0_57, %c0_58] : memref<1x1x128xf32, #tpu.memory_space<vmem>>, vector<1x1x128xf32>
    %65 = vector.shape_cast %64 : vector<1x1x128xf32> to vector<1x128xf32>
    %66 = vector.shape_cast %63 : vector<1x128xf32> to vector<1x1x128xf32>
    tpu.vector_store %arg19[%c0_56, %c0_57, %c0_58], %66 {strides = array<i32>} : memref<1x1x128xf32, #tpu.memory_space<vmem>>, vector<1x1x128xf32>,
    return
  }
  func.func @transform_0(%arg0: i32) -> (i32, i32, i32) {
    %c0_i32 = arith.constant 0 : i32
    %c0_i32_0 = arith.constant 0 : i32
    %c0_i32_1 = arith.constant 0 : i32
    return %arg0, %c0_i32, %c0_i32_0 : i32, i32, i32
  }
  func.func @transform_1(%arg0: i32) -> (i32, i32, i32) {
    %c0_i32 = arith.constant 0 : i32
    %c0_i32_0 = arith.constant 0 : i32
    %c0_i32_1 = arith.constant 0 : i32
    return %arg0, %c0_i32, %c0_i32_0 : i32, i32, i32
  }
  func.func @transform_2(%arg0: i32) -> (i32, i32, i32) {
    %c0_i32 = arith.constant 0 : i32
    %c0_i32_0 = arith.constant 0 : i32
    %c0_i32_1 = arith.constant 0 : i32
    return %arg0, %c0_i32, %c0_i32_0 : i32, i32, i32
  }
  func.func @transform_3(%arg0: i32) -> (i32, i32) {
    %c0_i32 = arith.constant 0 : i32
    %c0_i32_0 = arith.constant 0 : i32
    %c0_i32_1 = arith.constant 0 : i32
    return %c0_i32, %c0_i32_0 : i32, i32
  }
  func.func @transform_4(%arg0: i32) -> (i32, i32) {
    %c0_i32 = arith.constant 0 : i32
    %c0_i32_0 = arith.constant 0 : i32
    %c0_i32_1 = arith.constant 0 : i32
    return %c0_i32, %c0_i32_0 : i32, i32
  }
  func.func @transform_5(%arg0: i32) -> (i32, i32) {
    %c0_i32 = arith.constant 0 : i32
    %c0_i32_0 = arith.constant 0 : i32
    %c0_i32_1 = arith.constant 0 : i32
    return %c0_i32, %c0_i32_0 : i32, i32
  }
  func.func @transform_6(%arg0: i32) -> (i32, i32) {
    %c0_i32 = arith.constant 0 : i32
    %c0_i32_0 = arith.constant 0 : i32
    %c0_i32_1 = arith.constant 0 : i32
    return %c0_i32, %c0_i32_0 : i32, i32
  }
  func.func @transform_7(%arg0: i32) -> (i32, i32) {
    %c0_i32 = arith.constant 0 : i32
    %c0_i32_0 = arith.constant 0 : i32
    %c0_i32_1 = arith.constant 0 : i32
    return %c0_i32, %c0_i32_0 : i32, i32
  }
  func.func @transform_8(%arg0: i32) -> (i32, i32) {
    %c0_i32 = arith.constant 0 : i32
    %c0_i32_0 = arith.constant 0 : i32
    %c0_i32_1 = arith.constant 0 : i32
    return %c0_i32, %c0_i32_0 : i32, i32
  }
  func.func @transform_9(%arg0: i32) -> (i32, i32) {
    %c0_i32 = arith.constant 0 : i32
    %c0_i32_0 = arith.constant 0 : i32
    %c0_i32_1 = arith.constant 0 : i32
    return %c0_i32, %c0_i32_0 : i32, i32
  }
  func.func @transform_10(%arg0: i32) -> (i32, i32) {
    %c0_i32 = arith.constant 0 : i32
    %c0_i32_0 = arith.constant 0 : i32
    %c0_i32_1 = arith.constant 0 : i32
    return %c0_i32, %c0_i32_0 : i32, i32
  }
  func.func @transform_11(%arg0: i32) -> (i32, i32) {
    %c0_i32 = arith.constant 0 : i32
    %c0_i32_0 = arith.constant 0 : i32
    %c0_i32_1 = arith.constant 0 : i32
    return %c0_i32, %c0_i32_0 : i32, i32
  }
  func.func @transform_12(%arg0: i32) -> (i32, i32) {
    %c0_i32 = arith.constant 0 : i32
    %c0_i32_0 = arith.constant 0 : i32
    %c0_i32_1 = arith.constant 0 : i32
    return %c0_i32, %c0_i32_0 : i32, i32
  }
  func.func @transform_13(%arg0: i32) -> (i32, i32) {
    %c0_i32 = arith.constant 0 : i32
    %c0_i32_0 = arith.constant 0 : i32
    %c0_i32_1 = arith.constant 0 : i32
    return %c0_i32, %c0_i32_0 : i32, i32
  }
  func.func @transform_14(%arg0: i32) -> (i32, i32) {
    %c0_i32 = arith.constant 0 : i32
    %c0_i32_0 = arith.constant 0 : i32
    %c0_i32_1 = arith.constant 0 : i32
    return %c0_i32, %c0_i32_0 : i32, i32
  }
  func.func @transform_15(%arg0: i32) -> (i32, i32) {
    %c0_i32 = arith.constant 0 : i32
    %c0_i32_0 = arith.constant 0 : i32
    %c0_i32_1 = arith.constant 0 : i32
    return %c0_i32, %c0_i32_0 : i32, i32
  }
  func.func @transform_16(%arg0: i32) -> (i32, i32) {
    %c0_i32 = arith.constant 0 : i32
    %c0_i32_0 = arith.constant 0 : i32
    %c0_i32_1 = arith.constant 0 : i32
    return %c0_i32, %c0_i32_0 : i32, i32
  }
  func.func @transform_17(%arg0: i32) -> (i32, i32) {
    %c0_i32 = arith.constant 0 : i32
    %c0_i32_0 = arith.constant 0 : i32
    %c0_i32_1 = arith.constant 0 : i32
    return %c0_i32, %c0_i32_0 : i32, i32
  }
  func.func @transform_18(%arg0: i32) -> (i32, i32, i32) {
    %c0_i32 = arith.constant 0 : i32
    %c0_i32_0 = arith.constant 0 : i32
    %c0_i32_1 = arith.constant 0 : i32
    return %arg0, %c0_i32, %c0_i32_0 : i32, i32, i32
  }
  func.func @transform_19(%arg0: i32) -> (i32, i32, i32) {
    %c0_i32 = arith.constant 0 : i32
    %c0_i32_0 = arith.constant 0 : i32
    %c0_i32_1 = arith.constant 0 : i32
    return %arg0, %c0_i32, %c0_i32_0 : i32, i32, i32
  }
}

</mosaic_0001>

<bundles_post_ra>
// kernel: tpu_custom_call.1
= control target key start
LH: loop header
LB: loop body
LE: loop exit
PB: predicated region body
PF: predicated region fallthrough
CT: control target
= control target key end

     0   :  { %s4060_s0 = inlined_call_operand.hbm [shape: bf16[2,8,8], index: 0, kind: input, shape index: {}]   ;;  %s4061_s1 = inlined_call_operand.hbm [shape: bf16[2,8,128], index: 1, kind: input, shape index: {}]   ;;  %s4062_s2 = inlined_call_operand.vmem [shape: bf16[2,1,128], index: 2, kind: input, shape index: {}]   ;;  %s4063_s3 = inlined_call_operand.hbm [shape: bf16[128,128], index: 3, kind: input, shape index: {}]   ;;  %s4064_s4 = inlined_call_operand.hbm [shape: f32[1,128], index: 4, kind: input, shape index: {}]   ;;  %s4065_s5 = inlined_call_operand.hbm [shape: bf16[128,128], index: 5, kind: input, shape index: {}]   ;;  %s4066_s6 = inlined_call_operand.hbm [shape: f32[1,128], index: 6, kind: input, shape index: {}]   ;;  %s4067_s7 = inlined_call_operand.hbm [shape: bf16[128,128], index: 7, kind: input, shape index: {}]   ;;  %s4068_s8 = inlined_call_operand.hbm [shape: f32[1,128], index: 8, kind: input, shape index: {}]   ;;  %s4069_s9 = inlined_call_operand.hbm [shape: bf16[128,128], index: 9, kind: input, shape index: {}]   ;;  %s4070_s10 = inlined_call_operand.hbm [shape: f32[1,128], index: 10, kind: input, shape index: {}]   ;;  %s4071_s11 = inlined_call_operand.hbm [shape: bf16[128,128], index: 11, kind: input, shape index: {}]   ;;  %s4072_s12 = inlined_call_operand.hbm [shape: bf16[128,128], index: 12, kind: input, shape index: {}]   ;;  %s4073_s13 = inlined_call_operand.hbm [shape: f32[1,128], index: 13, kind: input, shape index: {}]   ;;  %s4074_s14 = inlined_call_operand.hbm [shape: bf16[128,128], index: 14, kind: input, shape index: {}]   ;;  %s4075_s15 = inlined_call_operand.hbm [shape: f32[1,128], index: 15, kind: input, shape index: {}]   ;;  %s4076_s16 = inlined_call_operand.vmem [shape: bf16[128,128], index: 16, kind: input, shape index: {}]   ;;  %s4077_s17 = inlined_call_operand.vmem [shape: f32[1,128], index: 17, kind: input, shape index: {}]   ;;  %s4078_s18 = inlined_call_operand.hbm [shape: f32[2,1,128], index: 18, kind: output, shape index: {0}]   ;;  %s4079_s19 = inlined_call_operand.hbm [shape: f32[2,1,128], index: 19, kind: output, shape index: {1}]  }
   0x1   :  { %4098 = sst [smem:[#allocation44_spill]] %s4060_s0 }
   0x2   :  { %4099 = sst [smem:[#allocation45_spill]] %s4061_s1 }
   0x3   :  { %4100 = sst [smem:[#allocation46_spill]] %s4062_s2 }
   0x4   :  { %4101 = sst [smem:[#allocation47_spill]] %s4063_s3 }
   0x5   :  { %4102 = sst [smem:[#allocation48_spill]] %s4064_s4 }
   0x6   :  { %4103 = sst [smem:[#allocation49_spill]] %s4065_s5 }
   0x7   :  { %4104 = sst [smem:[#allocation50_spill]] %s4066_s6 }
   0x8   :  { %4105 = sst [smem:[#allocation51_spill]] %s4067_s7 }
   0x9   :  { %4106 = sst [smem:[#allocation52_spill]] %s4068_s8 }
   0xa   :  { %4107 = sst [smem:[#allocation53_spill]] %s4069_s9 }
   0xb   :  { %4108 = sst [smem:[#allocation54_spill]] %s4076_s16 }
   0xc   :  { %4109 = sst [smem:[#allocation55_spill]] %s4077_s17 }
   0xd   :  { %4110 = sst [smem:[#allocation56_spill]] %s4078_s18 }
   0xe   :  { %4111 = sst [smem:[#allocation57_spill]] %s4079_s19 }
   0xf   :  { %25 = vsyncpa [#allocation3], 0 }
  0x10   :  { %27 = vsyncpa [#allocation3 + $0x1], 0 }
  0x11   :  { %28 = vsyncpa [#allocation6], 0 }
  0x12   :  { %30 = vsyncpa [#allocation6 + $0x1], 0 }
  0x13   :  { %31 = vsyncpa [#allocation9], 0 }
  0x14   :  { %32 = vsyncpa [#allocation12], 0 }
  0x15   :  { %33 = vsyncpa [#allocation15], 0 }
  0x16   :  { %34 = vsyncpa [#allocation18], 0 }
  0x17   :  { %35 = vsyncpa [#allocation21], 0 }
  0x18   :  { %36 = vsyncpa [#allocation24], 0 }
  0x19   :  { %37 = vsyncpa [#allocation4], 0 }
  0x1a   :  { %39 = vsyncpa [#allocation4 + $0x1], 0 }
  0x1b   :  { %40 = vsyncpa [#allocation28], 0 }
  0x1c   :  { %42 = vsyncpa [#allocation28 + $0x1], 0  ;;  %s3389_s0 = smov 0   ;;  %s3391_s30 = smov 0  }
  0x1d   :  { %s3393_s20 = smov 0   ;;  %s3395_s21 = smov 0  }
  0x1e LB: > { %4112 = sst [smem:[#allocation40_spill]] %s3254_s0  ;;  %s3268_s1 = smov [#allocation7]   ;;  %s3266_s21 = sphi %s3395_s21, %s4168_s21   ;;  %s3262_s20 = sphi %s3393_s20, %s4167_s20   ;;  %s3258_s30 = sphi %s3391_s30, %s4166_s30   ;;  %s3254_s0 = sphi %s3389_s0, %s4165_s0  }
  0x1f   : > { %4113 = sst [smem:[#allocation41_spill]] %s3258_s30  ;;  %s510_s22 = sshll.u32 %s3268_s1, 4  ;;  %s3415_s22 = int_to_ptr.vmem [resolvable:$true] %s510_s22 }
  0x20   : > { %s3410_s2 = sadd.s32 4294967295, %s3266_s21   ;;  %p2102_p0 = scmp.ge.s32.totalorder %s3266_s21, 1 }
  0x21   : > { %4114 = sst [smem:[#allocation42_spill]] %s3410_s2  ;;  %p4093_p1 = scmp.eq.s32.totalorder %s3410_s2, 0 }
  0x22   : > { %p498_p2 = scmp.lt.s32.totalorder %s3266_s21, 3  ;;  %s3269_s24 = smov [#allocation8]  }
  0x23   : > { %s524_s25 = sshll.u32 %s3269_s24, 4  ;;  %s3270_s26 = smov [#allocation11]   ;;  %s3430_s25 = int_to_ptr.vmem [resolvable:$true] %s524_s25 }
  0x24   : > { %p3417_p3 = pnand %p2102_p0, %p498_p2  ;;  %s548_s27 = sshll.u32 %s3270_s26, 4  ;;  %s3432_s27 = int_to_ptr.vmem [resolvable:$true] %s548_s27 }
  0x25   : > { %s4118_s1 = sld [smem:[#allocation47_spill]] }
  0x26   : > { %s4115_s23 = scalar_select %p3417_p3, 1, 0 }
  0x27   : > { %p2517_p5 = pneg %p3417_p3 }
  0x28   : > { %4116 = sst [smem:[#allocation43_spill]] %s4115_s23 }
  0x29   : > { %p3426_p6 = pnand %p2517_p5, %p4093_p1 }
  0x2b   : > { %s2712_s18 = scalar_lea.hbm %s4118_s1, 1024  ;;  %p3442_p8 = pneg %p3426_p6 }
  0x2c   : > { %p2713_p7 = scmp.ne.s32.totalorder %s4118_s1, %s2712_s18  ;;  %p2719_p11 = scmp.lt.u32.totalorder %s2712_s18, %s4118_s1 }
  0x2e   : > { %p2715_p9 = pnand %p3442_p8, %p2713_p7 }
  0x30   : > { %p2716_p10 = pneg %p2715_p9 }
  0x32   : > { %p2721_p12 = pnand %p2719_p11, %p2716_p10 }
  0x34   : > { %2724 = shalt.err (!%p2721_p12)
}
  0x35   : > { %s2725_s17 = scalar_lea.vmem %s3415_s22, 1024  ;;  %p2733_p5 = scmp.lt.s32.totalorder %s3415_s22, %s3415_s22 }
  0x36   : > { %p2726_p13 = scmp.ne.s32.totalorder %s3415_s22, %s2725_s17  ;;  %p2734_p4 = scmp.lt.s32.totalorder %s2725_s17, %s2725_s17 }
  0x38   : > { %p2728_p0 = pnand %p2726_p13, %p3442_p8  ;;  %p2735_p7 = por %p2734_p4, %p2733_p5 }
  0x3a   : > { %p2729_p2 = pneg %p2728_p0 }
  0x3c   : > { %p2736_p9 = pnand %p2735_p7, %p2729_p2 }
  0x3e   : > { %2739 = shalt.err (!%p2736_p9)
}
  0x3f   : > { %s4091_s19 = smov 64   ;;  %s3272_s16 = smov 4  }
  0x40   : > { %2520 = dma.hbm_to_vmem [thread:$0]  (!%p3426_p6), %s4118_s1, 1024, %s3415_s22, [#allocation6], %s4091_s19, %s4091_s19, %s3272_s16  }
  0x41   : > { %s4120_s4 = sld [smem:[#allocation48_spill]] }
  0x47   : > { %s2740_s17 = scalar_lea.hbm %s4120_s4, 16 }
  0x48   : > { %p2741_p4 = scmp.ne.s32.totalorder %s4120_s4, %s2740_s17  ;;  %p2747_p12 = scmp.lt.u32.totalorder %s2740_s17, %s4120_s4 }
  0x4a   : > { %p2743_p10 = pnand %p2741_p4, %p3442_p8 }
  0x4c   : > { %p2744_p11 = pneg %p2743_p10 }
  0x4e   : > { %p2749_p13 = pnand %p2747_p12, %p2744_p11 }
  0x50   : > { %2752 = shalt.err (!%p2749_p13)
}
  0x51   : > { %s2753_s22 = scalar_lea.vmem %s3430_s25, 16  ;;  %s2760_s2 = scalar_lea.vmem %s3430_s25, 32 }
  0x52   : > { %p2754_p0 = scmp.ne.s32.totalorder %s3430_s25, %s2753_s22  ;;  %p2761_p7 = scmp.lt.s32.totalorder %s3430_s25, %s3430_s25 }
  0x53   : > { %p2762_p9 = scmp.lt.s32.totalorder %s2760_s2, %s2753_s22 }
  0x54   : > { %p2756_p2 = pnand %p2754_p0, %p3442_p8 }
  0x55   : > { %p2763_p4 = por %p2762_p9, %p2761_p7 }
  0x56   : > { %p2757_p5 = pneg %p2756_p2 }
  0x58   : > { %p2764_p10 = pnand %p2763_p4, %p2757_p5 }
  0x5a   : > { %2767 = shalt.err (!%p2764_p10)
}
  0x5b   : > { %2523 = dma.hbm_to_vmem [thread:$0]  (!%p3426_p6), %s4120_s4, 16, %s3430_s25, [#allocation9]  }
  0x5c   : > { %s4121_s6 = sld [smem:[#allocation50_spill]] }
  0x62   : > { %s2768_s28 = scalar_lea.hbm %s4121_s6, 16 }
  0x63   : > { %p2769_p11 = scmp.ne.s32.totalorder %s4121_s6, %s2768_s28  ;;  %p2775_p0 = scmp.lt.u32.totalorder %s2768_s28, %s4121_s6 }
  0x65   : > { %p2771_p12 = pnand %p2769_p11, %p3442_p8 }
  0x67   : > { %p2772_p13 = pneg %p2771_p12 }
  0x69   : > { %p2777_p2 = pnand %p2775_p0, %p2772_p13 }
  0x6b   : > { %2780 = shalt.err (!%p2777_p2)
}
  0x6c   : > { %s2781_s25 = scalar_lea.vmem %s3432_s27, 16  ;;  %s2788_s2 = scalar_lea.vmem %s3432_s27, 32 }
  0x6d   : > { %p2782_p5 = scmp.ne.s32.totalorder %s3432_s27, %s2781_s25  ;;  %p2789_p4 = scmp.lt.s32.totalorder %s3432_s27, %s3432_s27 }
  0x6e   : > { %p2790_p10 = scmp.lt.s32.totalorder %s2788_s2, %s2781_s25 }
  0x6f   : > { %p2784_p7 = pnand %p2782_p5, %p3442_p8 }
  0x70   : > { %p2791_p11 = por %p2790_p10, %p2789_p4 }
  0x71   : > { %p2785_p9 = pneg %p2784_p7 }
  0x73   : > { %p2792_p12 = pnand %p2791_p11, %p2785_p9 }
  0x75   : > { %2795 = shalt.err (!%p2792_p12)
}
  0x76   : > { %2529 = dma.hbm_to_vmem [thread:$0]  (!%p3426_p6), %s4121_s6, 16, %s3432_s27, [#allocation12]  }
  0x77   : > { %s3273_s23 = smov [#allocation14]   ;;  %s3274_s28 = smov [#allocation17]  }
  0x78   : > { %s572_s18 = sshll.u32 %s3273_s23, 4  ;;  %s596_s29 = sshll.u32 %s3274_s28, 4  ;;  %s573_s18 = int_to_ptr.vmem [resolvable:$true] %s572_s18  ;;  %s597_s29 = int_to_ptr.vmem [resolvable:$true] %s596_s29 }
  0x79   : > { %s4122_s8 = sld [smem:[#allocation52_spill]] }
  0x7f   : > { %s2796_s22 = scalar_lea.hbm %s4122_s8, 16 }
  0x80   : > { %p2797_p13 = scmp.ne.s32.totalorder %s4122_s8, %s2796_s22  ;;  %p2803_p5 = scmp.lt.u32.totalorder %s2796_s22, %s4122_s8 }
  0x82   : > { %p2799_p0 = pnand %p2797_p13, %p3442_p8 }
  0x84   : > { %p2800_p2 = pneg %p2799_p0 }
  0x86   : > { %p2805_p7 = pnand %p2803_p5, %p2800_p2 }
  0x88   : > { %2808 = shalt.err (!%p2805_p7)
}
  0x89   : > { %s2809_s27 = scalar_lea.vmem %s573_s18, 16  ;;  %s2816_s30 = scalar_lea.vmem %s573_s18, 32 }
  0x8a   : > { %p2810_p9 = scmp.ne.s32.totalorder %s573_s18, %s2809_s27  ;;  %p2817_p11 = scmp.lt.s32.totalorder %s573_s18, %s573_s18 }
  0x8b   : > { %p2818_p12 = scmp.lt.s32.totalorder %s2816_s30, %s2809_s27 }
  0x8c   : > { %p2812_p4 = pnand %p2810_p9, %p3442_p8 }
  0x8d   : > { %p2819_p1 = por %p2818_p12, %p2817_p11 }
  0x8e   : > { %p2813_p10 = pneg %p2812_p4 }
  0x90   : > { %p2820_p3 = pnand %p2819_p1, %p2813_p10 }
  0x92   : > { %2823 = shalt.err (!%p2820_p3)
}
  0x93   : > { %2535 = dma.hbm_to_vmem [thread:$0]  (!%p3426_p6), %s4122_s8, 16, %s573_s18, [#allocation15]  }
  0x94   : > { %s2824_s17 = scalar_lea.hbm %s4070_s10, 16 }
  0x95   : > { %p2825_p13 = scmp.ne.s32.totalorder %s4070_s10, %s2824_s17  ;;  %p2831_p3 = scmp.lt.u32.totalorder %s2824_s17, %s4070_s10 }
  0x97   : > { %p2827_p0 = pnand %p2825_p13, %p3442_p8 }
  0x99   : > { %p2828_p1 = pneg %p2827_p0 }
  0x9b   : > { %p2833_p2 = pnand %p2831_p3, %p2828_p1 }
  0x9d   : > { %2836 = shalt.err (!%p2833_p2)
}
  0x9e   : > { %s2837_s27 = scalar_lea.vmem %s597_s29, 16  ;;  %s2844_s18 = scalar_lea.vmem %s597_s29, 32 }
  0x9f   : > { %p2838_p5 = scmp.ne.s32.totalorder %s597_s29, %s2837_s27  ;;  %p2845_p4 = scmp.lt.s32.totalorder %s597_s29, %s597_s29 }
  0xa0   : > { %p2846_p10 = scmp.lt.s32.totalorder %s2844_s18, %s2837_s27 }
  0xa1   : > { %p2840_p7 = pnand %p2838_p5, %p3442_p8 }
  0xa2   : > { %p2847_p11 = por %p2846_p10, %p2845_p4 }
  0xa3   : > { %p2841_p9 = pneg %p2840_p7 }
  0xa5   : > { %p2848_p12 = pnand %p2847_p11, %p2841_p9 }
  0xa7   : > { %2851 = shalt.err (!%p2848_p12)
}
  0xa8   : > { %2541 = dma.hbm_to_vmem [thread:$0]  (!%p3426_p6), %s4070_s10, 16, %s597_s29, [#allocation18]  }
  0xa9   : > { %s3275_s28 = smov [#allocation20]   ;;  %s3276_s26 = smov [#allocation23]  }
  0xaa   : > { %s619_s19 = sshll.u32 %s3275_s28, 4  ;;  %s643_s17 = sshll.u32 %s3276_s26, 4  ;;  %s620_s19 = int_to_ptr.vmem [resolvable:$true] %s619_s19  ;;  %s644_s17 = int_to_ptr.vmem [resolvable:$true] %s643_s17 }
  0xab   : > { %s2852_s2 = scalar_lea.hbm %s4072_s12, 1024 }
  0xac   : > { %p2853_p13 = scmp.ne.s32.totalorder %s4072_s12, %s2852_s2  ;;  %p2859_p3 = scmp.lt.u32.totalorder %s2852_s2, %s4072_s12 }
  0xae   : > { %p2855_p0 = pnand %p2853_p13, %p3442_p8 }
  0xb0   : > { %p2856_p1 = pneg %p2855_p0 }
  0xb2   : > { %p2861_p2 = pnand %p2859_p3, %p2856_p1 }
  0xb4   : > { %2864 = shalt.err (!%p2861_p2)
}
  0xb5   : > { %s2865_s29 = scalar_lea.vmem %s620_s19, 1024  ;;  %p2873_p4 = scmp.lt.s32.totalorder %s620_s19, %s620_s19 }
  0xb6   : > { %p2866_p5 = scmp.ne.s32.totalorder %s620_s19, %s2865_s29  ;;  %p2874_p10 = scmp.lt.s32.totalorder %s2865_s29, %s2865_s29 }
  0xb8   : > { %p2868_p7 = pnand %p2866_p5, %p3442_p8  ;;  %p2875_p11 = por %p2874_p10, %p2873_p4 }
  0xba   : > { %p2869_p9 = pneg %p2868_p7 }
  0xbc   : > { %p2876_p12 = pnand %p2875_p11, %p2869_p9 }
  0xbe   : > { %2879 = shalt.err (!%p2876_p12)
}
  0xbf   : > { %s4123_s23 = smov 64   ;;  %s2880_s2 = scalar_lea.hbm %s4074_s14, 1024 }
  0xc0   : > { %2547 = dma.hbm_to_vmem [thread:$0]  (!%p3426_p6), %s4072_s12, 1024, %s620_s19, [#allocation21], %s4123_s23, %s4123_s23, %s3272_s16  }
  0xc1   : > { %p2881_p13 = scmp.ne.s32.totalorder %s4074_s14, %s2880_s2  ;;  %p2887_p3 = scmp.lt.u32.totalorder %s2880_s2, %s4074_s14 }
  0xc3   : > { %p2883_p0 = pnand %p2881_p13, %p3442_p8 }
  0xc5   : > { %p2884_p1 = pneg %p2883_p0 }
  0xc7   : > { %p2889_p2 = pnand %p2887_p3, %p2884_p1 }
  0xc9   : > { %2892 = shalt.err (!%p2889_p2)
}
  0xca   : > { %s2893_s29 = scalar_lea.vmem %s644_s17, 1024  ;;  %p2901_p4 = scmp.lt.s32.totalorder %s644_s17, %s644_s17 }
  0xcb   : > { %p2894_p5 = scmp.ne.s32.totalorder %s644_s17, %s2893_s29  ;;  %p2902_p10 = scmp.lt.s32.totalorder %s2893_s29, %s2893_s29 }
  0xcd   : > { %p2896_p7 = pnand %p2894_p5, %p3442_p8  ;;  %p2903_p11 = por %p2902_p10, %p2901_p4 }
  0xcf   : > { %p2897_p9 = pneg %p2896_p7 }
  0xd1   : > { %p2904_p12 = pnand %p2903_p11, %p2897_p9 }
  0xd3   : > { %2907 = shalt.err (!%p2904_p12)
}
  0xd4   : > { %2553 = dma.hbm_to_vmem [thread:$0]  (!%p3426_p6), %s4074_s14, 1024, %s644_s17, [#allocation24], %s4123_s23, %s4123_s23, %s3272_s16  }
  0xd5   : > { %s3277_s26 = smov [#allocation10]   ;;  %s3278_s25 = smov [#allocation13]  }
  0xd6   : > { %s534_s22 = sshll.u32 %s3277_s26, 4  ;;  %s558_s2 = sshll.u32 %s3278_s25, 4  ;;  %s535_s22 = int_to_ptr.vmem [resolvable:$true] %s534_s22  ;;  %s559_s2 = int_to_ptr.vmem [resolvable:$true] %s558_s2 }
  0xd7   : > { %s4124_s5 = sld [smem:[#allocation49_spill]] }
  0xdd   : > { %s2908_s18 = scalar_lea.hbm %s4124_s5, 1024 }
  0xde   : > { %p2909_p13 = scmp.ne.s32.totalorder %s4124_s5, %s2908_s18  ;;  %p2915_p3 = scmp.lt.u32.totalorder %s2908_s18, %s4124_s5 }
  0xe0   : > { %p2911_p0 = pnand %p2909_p13, %p3442_p8 }
  0xe2   : > { %p2912_p1 = pneg %p2911_p0 }
  0xe4   : > { %p2917_p2 = pnand %p2915_p3, %p2912_p1 }
  0xe6   : > { %2920 = shalt.err (!%p2917_p2)
}
  0xe7   : > { %s2921_s17 = scalar_lea.vmem %s535_s22, 1024  ;;  %p2929_p4 = scmp.lt.s32.totalorder %s535_s22, %s535_s22 }
  0xe8   : > { %p2922_p5 = scmp.ne.s32.totalorder %s535_s22, %s2921_s17  ;;  %p2930_p10 = scmp.lt.s32.totalorder %s2921_s17, %s2921_s17 }
  0xea   : > { %p2924_p7 = pnand %p2922_p5, %p3442_p8  ;;  %p2931_p11 = por %p2930_p10, %p2929_p4 }
  0xec   : > { %p2925_p9 = pneg %p2924_p7 }
  0xee   : > { %p2932_p12 = pnand %p2931_p11, %p2925_p9 }
  0xf0   : > { %2935 = shalt.err (!%p2932_p12)
}
  0xf1   : > { %2526 = dma.hbm_to_vmem [thread:$0]  (!%p3426_p6), %s4124_s5, 1024, %s535_s22, [#allocation9], %s4123_s23, %s4123_s23, %s3272_s16  }
  0xf2   : > { %s4125_s7 = sld [smem:[#allocation51_spill]] }
  0xf8   : > { %s2936_s0 = scalar_lea.hbm %s4125_s7, 1024 }
  0xf9   : > { %p2937_p13 = scmp.ne.s32.totalorder %s4125_s7, %s2936_s0  ;;  %p2943_p3 = scmp.lt.u32.totalorder %s2936_s0, %s4125_s7 }
  0xfb   : > { %p2939_p0 = pnand %p2937_p13, %p3442_p8 }
  0xfd   : > { %p2940_p1 = pneg %p2939_p0 }
  0xff   : > { %p2945_p2 = pnand %p2943_p3, %p2940_p1 }
 0x101   : > { %2948 = shalt.err (!%p2945_p2)
}
 0x102   : > { %s2949_s19 = scalar_lea.vmem %s559_s2, 1024  ;;  %p2957_p4 = scmp.lt.s32.totalorder %s559_s2, %s559_s2 }
 0x103   : > { %p2950_p5 = scmp.ne.s32.totalorder %s559_s2, %s2949_s19  ;;  %p2958_p10 = scmp.lt.s32.totalorder %s2949_s19, %s2949_s19 }
 0x105   : > { %p2952_p7 = pnand %p2950_p5, %p3442_p8  ;;  %p2959_p11 = por %p2958_p10, %p2957_p4 }
 0x107   : > { %p2953_p9 = pneg %p2952_p7 }
 0x109   : > { %p2960_p12 = pnand %p2959_p11, %p2953_p9 }
 0x10b   : > { %2963 = shalt.err (!%p2960_p12)
}
 0x10c   : > { %2532 = dma.hbm_to_vmem [thread:$0]  (!%p3426_p6), %s4125_s7, 1024, %s559_s2, [#allocation12], %s4123_s23, %s4123_s23, %s3272_s16  }
 0x10d   : > { %s3279_s1 = smov [#allocation16]   ;;  %s3280_s26 = smov [#allocation19]  }
 0x10e   : > { %s582_s28 = sshll.u32 %s3279_s1, 4  ;;  %s606_s25 = sshll.u32 %s3280_s26, 4  ;;  %s583_s28 = int_to_ptr.vmem [resolvable:$true] %s582_s28  ;;  %s607_s25 = int_to_ptr.vmem [resolvable:$true] %s606_s25 }
 0x10f   : > { %s4126_s9 = sld [smem:[#allocation53_spill]] }
 0x115   : > { %s2964_s18 = scalar_lea.hbm %s4126_s9, 1024 }
 0x116   : > { %p2965_p13 = scmp.ne.s32.totalorder %s4126_s9, %s2964_s18  ;;  %p2971_p3 = scmp.lt.u32.totalorder %s2964_s18, %s4126_s9 }
 0x118   : > { %p2967_p0 = pnand %p2965_p13, %p3442_p8 }
 0x11a   : > { %p2968_p1 = pneg %p2967_p0 }
 0x11c   : > { %p2973_p2 = pnand %p2971_p3, %p2968_p1 }
 0x11e   : > { %2976 = shalt.err (!%p2973_p2)
}
 0x11f   : > { %s2977_s2 = scalar_lea.vmem %s583_s28, 1024  ;;  %p2985_p4 = scmp.lt.s32.totalorder %s583_s28, %s583_s28 }
 0x120   : > { %p2978_p5 = scmp.ne.s32.totalorder %s583_s28, %s2977_s2  ;;  %p2986_p10 = scmp.lt.s32.totalorder %s2977_s2, %s2977_s2 }
 0x122   : > { %p2980_p7 = pnand %p2978_p5, %p3442_p8  ;;  %p2987_p11 = por %p2986_p10, %p2985_p4 }
 0x124   : > { %p2981_p9 = pneg %p2980_p7 }
 0x126   : > { %p2988_p12 = pnand %p2987_p11, %p2981_p9 }
 0x128   : > { %2991 = shalt.err (!%p2988_p12)
}
 0x129   : > { %2538 = dma.hbm_to_vmem [thread:$0]  (!%p3426_p6), %s4126_s9, 1024, %s583_s28, [#allocation15], %s4123_s23, %s4123_s23, %s3272_s16  }
 0x12a   : > { %s2992_s27 = scalar_lea.hbm %s4071_s11, 1024 }
 0x12b   : > { %p2993_p13 = scmp.ne.s32.totalorder %s4071_s11, %s2992_s27  ;;  %p2999_p3 = scmp.lt.u32.totalorder %s2992_s27, %s4071_s11 }
 0x12d   : > { %p2995_p0 = pnand %p2993_p13, %p3442_p8 }
 0x12f   : > { %p2996_p1 = pneg %p2995_p0 }
 0x131   : > { %p3001_p2 = pnand %p2999_p3, %p2996_p1 }
 0x133   : > { %3004 = shalt.err (!%p3001_p2)
}
 0x134   : > { %s3005_s22 = scalar_lea.vmem %s607_s25, 1024  ;;  %p3013_p4 = scmp.lt.s32.totalorder %s607_s25, %s607_s25 }
 0x135   : > { %p3006_p5 = scmp.ne.s32.totalorder %s607_s25, %s3005_s22  ;;  %p3014_p10 = scmp.lt.s32.totalorder %s3005_s22, %s3005_s22 }
 0x137   : > { %p3008_p7 = pnand %p3006_p5, %p3442_p8  ;;  %p3015_p11 = por %p3014_p10, %p3013_p4 }
 0x139   : > { %p3009_p9 = pneg %p3008_p7 }
 0x13b   : > { %p3016_p12 = pnand %p3015_p11, %p3009_p9 }
 0x13d   : > { %3019 = shalt.err (!%p3016_p12)
}
 0x13e   : > { %2544 = dma.hbm_to_vmem [thread:$0]  (!%p3426_p6), %s4071_s11, 1024, %s607_s25, [#allocation18], %s4123_s23, %s4123_s23, %s3272_s16  }
 0x13f   : > { %s3281_s17 = smov [#allocation22]   ;;  %s3282_s26 = smov [#allocation25]  }
 0x140   : > { %s633_s1 = sshll.u32 %s3281_s17, 4  ;;  %s657_s0 = sshll.u32 %s3282_s26, 4  ;;  %s634_s1 = int_to_ptr.vmem [resolvable:$true] %s633_s1  ;;  %s658_s0 = int_to_ptr.vmem [resolvable:$true] %s657_s0 }
 0x141   : > { %s3020_s30 = scalar_lea.hbm %s4073_s13, 16 }
 0x142   : > { %p3021_p13 = scmp.ne.s32.totalorder %s4073_s13, %s3020_s30  ;;  %p3027_p3 = scmp.lt.u32.totalorder %s3020_s30, %s4073_s13 }
 0x144   : > { %p3023_p0 = pnand %p3021_p13, %p3442_p8 }
 0x146   : > { %p3024_p1 = pneg %p3023_p0 }
 0x148   : > { %p3029_p2 = pnand %p3027_p3, %p3024_p1 }
 0x14a   : > { %3032 = shalt.err (!%p3029_p2)
}
 0x14b   : > { %s3033_s16 = scalar_lea.vmem %s634_s1, 16  ;;  %s3040_s23 = scalar_lea.vmem %s634_s1, 32 }
 0x14c   : > { %p3034_p5 = scmp.ne.s32.totalorder %s634_s1, %s3033_s16  ;;  %p3041_p4 = scmp.lt.s32.totalorder %s634_s1, %s634_s1 }
 0x14d   : > { %p3042_p10 = scmp.lt.s32.totalorder %s3040_s23, %s3033_s16 }
 0x14e   : > { %p3036_p7 = pnand %p3034_p5, %p3442_p8 }
 0x14f   : > { %p3043_p11 = por %p3042_p10, %p3041_p4 }
 0x150   : > { %p3037_p9 = pneg %p3036_p7 }
 0x152   : > { %p3044_p12 = pnand %p3043_p11, %p3037_p9 }
 0x154   : > { %3047 = shalt.err (!%p3044_p12)
}
 0x155   : > { %2550 = dma.hbm_to_vmem [thread:$0]  (!%p3426_p6), %s4073_s13, 16, %s634_s1, [#allocation21]  }
 0x156   : > { %s3048_s27 = scalar_lea.hbm %s4075_s15, 16 }
 0x157   : > { %p3049_p13 = scmp.ne.s32.totalorder %s4075_s15, %s3048_s27  ;;  %p3055_p3 = scmp.lt.u32.totalorder %s3048_s27, %s4075_s15 }
 0x159   : > { %p3051_p0 = pnand %p3049_p13, %p3442_p8 }
 0x15b   : > { %p3052_p1 = pneg %p3051_p0 }
 0x15d   : > { %p3057_p2 = pnand %p3055_p3, %p3052_p1 }
 0x15f   : > { %3060 = shalt.err (!%p3057_p2)
}
 0x160   : > { %s3061_s22 = scalar_lea.vmem %s658_s0, 16  ;;  %s3068_s1 = scalar_lea.vmem %s658_s0, 32 }
 0x161   : > { %p3062_p5 = scmp.ne.s32.totalorder %s658_s0, %s3061_s22  ;;  %p3069_p4 = scmp.lt.s32.totalorder %s658_s0, %s658_s0 }
 0x162   : > { %p3070_p10 = scmp.lt.s32.totalorder %s3068_s1, %s3061_s22 }
 0x163   : > { %p3064_p7 = pnand %p3062_p5, %p3442_p8 }
 0x164   : > { %p3071_p11 = por %p3070_p10, %p3069_p4 }
 0x165   : > { %p3065_p9 = pneg %p3064_p7 }
 0x167   : > { %p3072_p12 = pnand %p3071_p11, %p3065_p9 }
 0x169   : > { %3075 = shalt.err (!%p3072_p12)
}
 0x16a   : > { %s4127_s23 = sld [smem:[#allocation41_spill]]  ;;  %s4128_s24 = sld [smem:[#allocation40_spill]] }
 0x16b   : > { %s4129_s25 = sld [smem:[#allocation42_spill]]  ;;  %s2101_s2 = sadd.s32 4294967294, %s3266_s21  }
 0x16c   : > { %2556 = dma.hbm_to_vmem [thread:$0]  (!%p3426_p6), %s4075_s15, 16, %s658_s0, [#allocation24]  }
 0x16d   : > { %s3714_s3 = sadd.s32 1, %s3266_s21   ;;  %s55_s17 = sadd.s32 1, %s3262_s20 }
 0x16e   : > { %s52_s26 = ssub.s32 %s3266_s21, %s3714_s3  ;;  %p63_p0 = scmp.eq.s32.totalorder %s3266_s21, 0 }
 0x16f   : > { %p53_p13 = scmp.eq.s32.totalorder %s52_s26, 0  ;;  %p465_p9 = scmp.eq.s32.totalorder %s2101_s2, 1 }
 0x170   : > { %p62_p8 = scmp.ne.s32.totalorder %s3262_s20, %s4127_s23  ;;  %p68_p1 = scmp.ne.s32.totalorder %s4127_s23, %s4128_s24 }
 0x171   : > { %p459_p3 = scmp.eq.s32.totalorder %s4129_s25, 1  ;;  %p4130_p5 = scmp.eq.s32.totalorder %s4129_s25, 0 }
 0x172   : > { %s3726_s27 = scalar_select %p53_p13, %s3262_s20, %s55_s17  }
 0x173   : > { %p64_p2 = por %p63_p0, %p62_p8  ;;  %p3730_p7 = por %p4130_p5, %p68_p1 }
 0x174   : > { %p3734_p6 = por %p459_p3, %p62_p8  ;;  %p2584_p4 = scmp.lt.s32.totalorder %s3266_s21, 2 }
 0x175   : > { %s4131_s18 = scalar_select %p3730_p7, 1, 0 }
 0x176   : > { %s4132_s0 = scalar_select %p3734_p6, 1, 0 }
 0x177   : > { %s674_s30 = sand.u32 1, %s3262_s20   ;;  %p3740_p10 = por %p465_p9, %p68_p1 }
 0x178   : > { %s3744_s19 = sshll.u32 %s674_s30, 2  ;;  %s2118_s22 = sshll.u32 %s3266_s21, 6 }
 0x179   : > { %s4133_s29 = scalar_select %p3740_p10, 1, 0 }
 0x17a   : > { %s4134_s16 = sld [smem:[#allocation44_spill]]  ;;  %s678_s24 = scalar_lea.vmem [#allocation2], %s3744_s19 }
 0x17b   : > { %s685_s25 = sshll.u32 %s678_s24, 4  ;;  %p3753_p11 = pnand %p2584_p4, %p64_p2  ;;  %s3757_s25 = int_to_ptr.vmem [resolvable:$true] %s685_s25 }
 0x17c   : > { %s4136_s4 = sld [smem:[#allocation45_spill]]  ;;  %s675_s28 = scalar_lea.sflag [#allocation3], %s674_s30 }
 0x17d   : > { %p3078_p8 = pneg %p3753_p11 }
 0x180   : > { %s3750_s23 = scalar_lea.hbm %s4134_s16, %s2118_s22  ;;  %s3081_s7 = scalar_lea.hbm %s4134_s16, 128 }
 0x181   : > { %s3076_s5 = scalar_lea.hbm %s3750_s23, 64  ;;  %p3082_p1 = scmp.lt.u32.totalorder %s3750_s23, %s4134_s16 }
 0x182   : > { %s3762_s1 = scalar_lea.hbm %s4136_s4, %s2118_s22  ;;  %p3077_p12 = scmp.ne.s32.totalorder %s3750_s23, %s3076_s5 }
 0x183   : > { %p3083_p3 = scmp.lt.u32.totalorder %s3081_s7, %s3076_s5  ;;  %p3085_p5 = scmp.lt.u32.totalorder %s3076_s5, %s3750_s23 }
 0x184   : > { %p3079_p13 = pnand %p3078_p8, %p3077_p12 }
 0x185   : > { %p3084_p2 = por %p3083_p3, %p3082_p1 }
 0x186   : > { %p3080_p0 = pneg %p3079_p13 }
 0x187   : > { %p3086_p9 = por %p3085_p5, %p3084_p2 }
 0x189   : > { %p3087_p4 = pnand %p3086_p9, %p3080_p0 }
 0x18b   : > { %3090 = shalt.err (!%p3087_p4)
}
 0x18c   : > { %s3091_s30 = scalar_lea.vmem %s3757_s25, 64  ;;  %s3283_s6 = smov [#allocation2]  }
 0x18d   : > { %p3092_p12 = scmp.ne.s32.totalorder %s3757_s25, %s3091_s30  ;;  %s3096_s22 = sshll.u32 %s3283_s6, 4  ;;  %s3097_s22 = int_to_ptr.vmem [resolvable:$false] %s3096_s22 }
 0x18e   : > { %s3098_s8 = scalar_lea.vmem %s3097_s22, 128  ;;  %p3099_p6 = scmp.lt.s32.totalorder %s3757_s25, %s3097_s22 }
 0x18f   : > { %p3094_p13 = pnand %p3092_p12, %p3078_p8  ;;  %p3100_p1 = scmp.lt.s32.totalorder %s3098_s8, %s3091_s30 }
 0x191   : > { %p3095_p10 = pneg %p3094_p13  ;;  %p3101_p3 = por %p3100_p1, %p3099_p6 }
 0x193   : > { %p3102_p2 = pnand %p3101_p3, %p3095_p10 }
 0x195   : > { %3105 = shalt.err (!%p3102_p2)
}
 0x196   : > { %2560 = dma.hbm_to_vmem [thread:$0]  (!%p3753_p11), %s3750_s23, 64, %s3757_s25, %s675_s28  }
 0x197   : > { %s692_s5 = sand.u32 1, %s3266_s21   ;;  %s696_s7 = scalar_lea.vmem [#allocation5], %s3744_s19 }
 0x198   : > { %s703_s9 = sshll.u32 %s696_s7, 4  ;;  %s693_s17 = scalar_lea.sflag [#allocation6], %s692_s5  ;;  %s704_s9 = int_to_ptr.vmem [resolvable:$true] %s703_s9 }
 0x199   : > { %s3106_s26 = scalar_lea.hbm %s3762_s1, 64  ;;  %s3111_s6 = scalar_lea.hbm %s4136_s4, 128 }
 0x19a   : > { %p3107_p6 = scmp.ne.s32.totalorder %s3762_s1, %s3106_s26  ;;  %p3112_p5 = scmp.lt.u32.totalorder %s3762_s1, %s4136_s4 }
 0x19b   : > { %p3113_p9 = scmp.lt.u32.totalorder %s3111_s6, %s3106_s26  ;;  %p3115_p12 = scmp.lt.u32.totalorder %s3106_s26, %s3762_s1 }
 0x19c   : > { %p3109_p10 = pnand %p3107_p6, %p3078_p8 }
 0x19d   : > { %p3114_p4 = por %p3113_p9, %p3112_p5 }
 0x19e   : > { %p3110_p0 = pneg %p3109_p10 }
 0x19f   : > { %p3116_p13 = por %p3115_p12, %p3114_p4 }
 0x1a1   : > { %p3117_p1 = pnand %p3116_p13, %p3110_p0 }
 0x1a3   : > { %3120 = shalt.err (!%p3117_p1)
}
 0x1a4   : > { %s3121_s19 = scalar_lea.vmem %s704_s9, 64  ;;  %s3284_s23 = smov [#allocation5]  }
 0x1a5   : > { %p3122_p3 = scmp.ne.s32.totalorder %s704_s9, %s3121_s19  ;;  %s3126_s25 = sshll.u32 %s3284_s23, 4  ;;  %s3127_s25 = int_to_ptr.vmem [resolvable:$false] %s3126_s25 }
 0x1a6   : > { %s3128_s28 = scalar_lea.vmem %s3127_s25, 128  ;;  %p3129_p10 = scmp.lt.s32.totalorder %s704_s9, %s3127_s25 }
 0x1a7   : > { %p3124_p2 = pnand %p3122_p3, %p3078_p8  ;;  %p3130_p7 = scmp.lt.s32.totalorder %s3128_s28, %s3121_s19 }
 0x1a9   : > { %p3125_p6 = pneg %p3124_p2  ;;  %p3131_p5 = por %p3130_p7, %p3129_p10 }
 0x1ab   : > { %p3132_p9 = pnand %p3131_p5, %p3125_p6 }
 0x1ad   : > { %3135 = shalt.err (!%p3132_p9)
}
 0x1ae   : > { %2563 = dma.hbm_to_vmem [thread:$0]  (!%p3753_p11), %s3762_s1, 64, %s704_s9, %s693_s17  }
 0x1af   : > { %s4137_s5 = sld [smem:[#allocation43_spill]] }
 0x1b5   : > { %p4138_p0 = scmp.ne.s32.totalorder %s4137_s5, 0 }
 0x1b6   : > { %s4139_s7 = sld [smem:[#allocation41_spill]] (!%p4138_p0)  ;;  %p4140_p7 = scmp.ne.s32.totalorder (!%p4138_p0), %s4131_s18, 0 }
 0x1b7   : > { %718 = sbr.rel (%p4138_p0) target bundleno = 2466 (0x9a2), region = 92 }
 0x1bc   : > { %s3813_s26 = sand.u32 (!%p4138_p0), 1, %s4139_s7  }
 0x1bd   : > { %s2122_s24 = sshll.u32 (!%p4138_p0), %s3813_s26, 2  ;;  %s721_s30 = scalar_lea.sflag (!%p4138_p0), [#allocation3], %s3813_s26 }
 0x1be   : > { %s3817_s6 = scalar_lea.vmem [#allocation2], %s2122_s24 }
 0x1bf   : > { %3209 = dma.done.wait (%p4140_p7), %s721_s30, 64  }
 0x1c0   : > { %3211 = vsyncadd (%p4140_p7), %s721_s30, 4294967232  ;;  %s4141_s2 = sld [smem:[#allocation42_spill]]  ;;  %s733_s17 = scalar_lea.vmem [#allocation5], %s2122_s24 }
 0x1c6   : > { %s729_s1 = sand.u32 1, %s4141_s2  }
 0x1c7   : > { %s730_s9 = scalar_lea.sflag [#allocation6], %s729_s1 }
 0x1c8   : > { %3213 = dma.done.wait (%p4140_p7), %s730_s9, 64  }
 0x1c9   : > { %3215 = vsyncadd (%p4140_p7), %s730_s9, 4294967232  ;;  %p4142_p11 = scmp.eq.s32.totalorder %s4141_s2, 0 }
 0x1cb   : > { %3217 = dma.done.wait (%p4142_p11), [#allocation6], 1024   ;;  %p4143_p8 = pmov %p4142_p11 }
 0x1cd   : > { %3219 = vsyncadd (%p4143_p8), [#allocation6], 4294966272  ;;  %p4144_p4 = pmov %p4143_p8 }
 0x1cf   : > { %3221 = dma.done.wait (%p4144_p4), [#allocation9], 1040   ;;  %p4145_p12 = pmov %p4144_p4 }
 0x1d0   : > { %p4146_p13 = pmov %p4144_p4 }
 0x1d1   : > { %3223 = vsyncadd (%p4145_p12), [#allocation9], 4294966256 }
 0x1d2   : > { %3225 = dma.done.wait (%p4146_p13), [#allocation12], 1040   ;;  %p4147_p1 = pmov %p4144_p4 }
 0x1d4   : > { %3227 = vsyncadd (%p4147_p1), [#allocation12], 4294966256  ;;  %p4148_p3 = pmov %p4147_p1 }
 0x1d5   : > { %p4149_p2 = pmov %p4147_p1 }
 0x1d6   : > { %3229 = dma.done.wait (%p4148_p3), [#allocation15], 1040  }
 0x1d7   : > { %3231 = vsyncadd (%p4149_p2), [#allocation15], 4294966256  ;;  %p4150_p6 = pmov %p4147_p1 }
 0x1d8   : > { %p4151_p10 = pmov %p4147_p1 }
 0x1d9   : > { %3233 = dma.done.wait (%p4150_p6), [#allocation18], 1040  }
 0x1da   : > { %3235 = vsyncadd (%p4151_p10), [#allocation18], 4294966256  ;;  %p4152_p5 = pmov %p4147_p1 }
 0x1db   : > { %p4153_p9 = pmov %p4147_p1 }
 0x1dc   : > { %3237 = dma.done.wait (%p4152_p5), [#allocation21], 1040  }
 0x1dd   : > { %3239 = vsyncadd (%p4153_p9), [#allocation21], 4294966256  ;;  %p4154_p0 = pmov %p4147_p1 }
 0x1df   : > { %3241 = dma.done.wait (%p4154_p0), [#allocation24], 1040   ;;  %p4155_p7 = pmov %p4154_p0 }
 0x1e0   : > { %v3285_v0 = vmov 0.0   ;;  %vm3286_vm0 = vmmov 0   ;;  %vm878_vm1 = vcmask 1043456   ;;  %v856_v1 = vld [vmem:[%s733_s17] sm:$0xf]  ;;  %vm874_vm2 = vcmask 64512  }
 0x1e1   : > { %3243 = vsyncadd (%p4155_p7), [#allocation24], 4294966256  ;;  %2285 = vmatprep.subr.bf16.mxu1 %v3285_v0  ;;  %2287 = vmatprep.mubr.msk.bf16.mxu1 %vm3286_vm0, %v3285_v0  ;;  %v855_v2 = vld [vmem:[%s3817_s6] sm:$0xf]  ;;  %v880_v3 = vsel %vm878_vm1, %v856_v1, 0  ;;  %v2648_v4 = vld [vmem:[#allocation7] sm:$0xff]  }
 0x1e2   : > { %2311 = vmatprep.subr.bf16.mxu0 %v3285_v0  ;;  %2313 = vmatprep.mubr.msk.bf16.mxu0 %vm3286_vm0, %v3285_v0  ;;  %v2649_v5 = vld [vmem:[#allocation7 + $0x8] sm:$0xff]   ;;  %v2650_v6 = vld [vmem:[#allocation7 + $0x10] sm:$0xff]   ;;  %v2651_v7 = vld [vmem:[#allocation7 + $0x18] sm:$0xff]   ;;  %p851_p11 = scmp.lt.s32.totalorder %s4141_s2, 1  ;;  %s4156_s19 = sld [smem:[#allocation46_spill]] }
 0x1e3   : > { %2286 = vmatpush3.bf16.msra.mxu1 %v880_v3  ;;  %v2652_v8 = vld [vmem:[#allocation7 + $0x20] sm:$0xff]   ;;  %v2653_v9 = vld [vmem:[#allocation7 + $0x28] sm:$0xff]   ;;  %v2654_v10 = vld [vmem:[#allocation7 + $0x30] sm:$0xff]   ;;  %s850_s25 = scalar_lea.vmem [#allocation27], %s3813_s26  ;;  %s4157_s7 = sld [smem:[#allocation54_spill]] }
 0x1e4   : > { %2291 = vmatprep.subr.bf16.mxu1 %v3285_v0  ;;  %v2655_v11 = vld [vmem:[#allocation7 + $0x38] sm:$0xff]   ;;  %v2138_v17 = vld [vmem:[#allocation8] ss:$0 sm:$0xff]  ;;  %v2656_v26 = vld [vmem:[#allocation10] sm:$0xff]   ;;  %s852_s18 = scalar_select %p851_p11, %s4141_s2, 1 }
 0x1e5   : > { %v2657_v27 = vld [vmem:[#allocation10 + $0x8] sm:$0xff]   ;;  %v2658_v28 = vld [vmem:[#allocation10 + $0x10] sm:$0xff]   ;;  %v2659_v29 = vld [vmem:[#allocation10 + $0x18] sm:$0xff]   ;;  %s2205_s30 = sshll.u32 %s4141_s2, 4  ;;  %s4158_s9 = sld [smem:[#allocation57_spill]] }
 0x1e6   : > { %2288 = vmatmul.mubr.msk.bf16.vlgmr.msra.gmra.mrb[0].mxu1 %vm874_vm2, %v855_v2  ;;  %v2660_v30 = vld [vmem:[#allocation10 + $0x20] sm:$0xff]   ;;  %v2661_v31 = vld [vmem:[#allocation10 + $0x28] sm:$0xff]   ;;  %v2662_v32 = vld [vmem:[#allocation10 + $0x30] sm:$0xff]   ;;  %s1827_s22 = scalar_lea.sflag [#allocation28], %s3813_s26  ;;  %p4159_p4 = scmp.ne.s32.totalorder %s4132_s0, 0 }
 0x1e7   : > { %2292 = vmatpush3.bf16.msra.mxu1 %v2648_v4  ;;  %2307 = vmatprep.mubr.msk.bf16.mxu1 %vm3286_vm0, %v3285_v0  ;;  %v2663_v33 = vld [vmem:[#allocation10 + $0x38] sm:$0xff]   ;;  %v2664_v34 = vld [vmem:[#allocation13] sm:$0xff]   ;;  %v2665_v35 = vld [vmem:[#allocation13 + $0x8] sm:$0xff]  }
 0x1e8   : > { %2293 = vmatprep.subr.bf16.mxu1 %v3285_v0  ;;  %v2666_v36 = vld [vmem:[#allocation13 + $0x10] sm:$0xff]   ;;  %v2667_v42 = vld [vmem:[#allocation13 + $0x18] sm:$0xff]   ;;  %v2668_v43 = vld [vmem:[#allocation13 + $0x20] sm:$0xff]   ;;  %s853_s23 = scalar_lea.vmem %s4156_s19, %s852_s18  ;;  %s1852_s18 = sshll.u32 %s850_s25, 4  ;;  %s1853_s18 = int_to_ptr.vmem [resolvable:$true] %s1852_s18 }
 0x1e9   : > { %v2669_v44 = vld [vmem:[#allocation13 + $0x28] sm:$0xff]   ;;  %v2670_v45 = vld [vmem:[#allocation13 + $0x30] sm:$0xff]   ;;  %v2671_v46 = vld [vmem:[#allocation13 + $0x38] sm:$0xff]   ;;  %s3136_s8 = scalar_lea.vmem %s1853_s18, 16  ;;  %s3287_s19 = smov [#allocation27]  }
 0x1ea   : > { %v2672_v47 = vld [vmem:[#allocation16] sm:$0xff]   ;;  %v2673_v48 = vld [vmem:[#allocation16 + $0x8] sm:$0xff]   ;;  %v2674_v49 = vld [vmem:[#allocation16 + $0x10] sm:$0xff]   ;;  %p3137_p8 = scmp.ne.s32.totalorder %s1853_s18, %s3136_s8 }
 0x1eb   : > { %2294 = vmatpush3.bf16.msra.mxu1 %v2649_v5  ;;  %v2675_v50 = vld [vmem:[#allocation16 + $0x18] sm:$0xff]   ;;  %v2676_v51 = vld [vmem:[#allocation16 + $0x20] sm:$0xff]   ;;  %v2677_v52 = vld [vmem:[#allocation16 + $0x28] sm:$0xff]   ;;  %s3985_s17 = scalar_lea.hbm %s4158_s9, %s2205_s30 }
 0x1ec   : > { %2295 = vmatprep.subr.bf16.mxu1 %v3285_v0  ;;  %v2148_v53 = vld [vmem:[#allocation11] ss:$0 sm:$0xff]  ;;  %v2678_v4 = vld [vmem:[#allocation16 + $0x30] sm:$0xff]   ;;  %p3138_p12 = pnand %p3137_p8, %p4159_p4 }
 0x1ed   : > { %v2679_v5 = vld [vmem:[#allocation16 + $0x38] sm:$0xff]  }
 0x1ee   : > { %p3139_p13 = pneg %p3138_p12 }
 0x1ef   : > { %2296 = vmatpush3.bf16.msra.mxu1 %v2650_v6  ;;  %v2680_v6 = vld [vmem:[#allocation20] sm:$0xff]  }
 0x1f0   : > { %2297 = vmatprep.subr.bf16.mxu1 %v3285_v0 }
 0x1f3   : > { %2298 = vmatpush3.bf16.msra.mxu1 %v2651_v7  ;;  %v2682_v7 = vld [vmem:[#allocation20 + $0x8] sm:$0xff]  }
 0x1f4   : > { %2299 = vmatprep.subr.bf16.mxu1 %v3285_v0 }
 0x1f7   : > { %2300 = vmatpush3.bf16.msra.mxu1 %v2652_v8  ;;  %v2684_v8 = vld [vmem:[#allocation20 + $0x10] sm:$0xff]  }
 0x1f8   : > { %2301 = vmatprep.subr.bf16.mxu1 %v3285_v0 }
 0x1fb   : > { %2302 = vmatpush3.bf16.msra.mxu1 %v2653_v9  ;;  %v2686_v9 = vld [vmem:[#allocation20 + $0x18] sm:$0xff]  }
 0x1fc   : > { %2303 = vmatprep.subr.bf16.mxu1 %v3285_v0 }
 0x1ff   : > { %2304 = vmatpush3.bf16.msra.mxu1 %v2654_v10  ;;  %v2688_v10 = vld [vmem:[#allocation20 + $0x20] sm:$0xff]  }
 0x200   : > { %2305 = vmatprep.subr.bf16.mxu1 %v3285_v0 }
 0x203   : > { %2306 = vmatpush3.bf16.msra.mxu1 %v2655_v11  ;;  %v2690_v11 = vld [vmem:[#allocation20 + $0x28] sm:$0xff]  }
 0x204   : > { %2337 = vmatprep.subr.bf16.mxu1 %v3285_v0 }
 0x2b9   : > { %v916_v12 = vpop.f32.mrb[0].mxu1 }
 0x2ba   : > { %v922_v13 = vpack.c.bf16 %v916_v12, %v916_v12  ;;  %v2289_v14 = vpop.f32.mrb[1].mxu1  ;;  %v2692_v12 = vld [vmem:[#allocation20 + $0x30] sm:$0xff]  }
 0x2bb   : > { %v919_v15 = vpop.f32.mrb[2].mxu1  ;;  %v1198_v14 = vld [vmem:[#allocation14] sm:$0x1] }
 0x2bc   : > { %v2290_v16 = vpop.f32.mrb[3].mxu1  ;;  %2308 = vmatmul.mubr.bf16.vlgmr.msra.gmra.mrb[4].mxu1 %v922_v13  ;;  %v2694_v13 = vld [vmem:[#allocation20 + $0x38] sm:$0xff]  }
 0x2bd   : > { %2353 = vmatprep.mubr.msk.bf16.mxu1 %vm3286_vm0, %v3285_v0  ;;  %2338 = vmatpush3.bf16.msra.mxu1 %v2664_v34  ;;  %v2699_v34 = vld [vmem:[#allocation23 + $0x18] sm:$0xff]  }
 0x2be   : > { %2339 = vmatprep.subr.bf16.mxu1 %v3285_v0 }
 0x2c1   : > { %2340 = vmatpush3.bf16.msra.mxu1 %v2665_v35  ;;  %v2700_v35 = vld [vmem:[#allocation23 + $0x20] sm:$0xff]  }
 0x2c2   : > { %2341 = vmatprep.subr.bf16.mxu1 %v3285_v0 }
 0x2c5   : > { %2342 = vmatpush3.bf16.msra.mxu1 %v2666_v36  ;;  %v2701_v36 = vld [vmem:[#allocation23 + $0x28] sm:$0xff]  }
 0x2c6   : > { %2343 = vmatprep.subr.bf16.mxu1 %v3285_v0 }
 0x2c9   : > { %2344 = vmatpush3.bf16.msra.mxu1 %v2667_v42 }
 0x2ca   : > { %2345 = vmatprep.subr.bf16.mxu1 %v3285_v0 }
 0x2cd   : > { %2346 = vmatpush3.bf16.msra.mxu1 %v2668_v43 }
 0x2ce   : > { %2347 = vmatprep.subr.bf16.mxu1 %v3285_v0 }
 0x2d1   : > { %2348 = vmatpush3.bf16.msra.mxu1 %v2669_v44 }
 0x2d2   : > { %2349 = vmatprep.subr.bf16.mxu1 %v3285_v0 }
 0x2d5   : > { %2350 = vmatpush3.bf16.msra.mxu1 %v2670_v45 }
 0x2d6   : > { %2351 = vmatprep.subr.bf16.mxu1 %v3285_v0 }
 0x2d9   : > { %2352 = vmatpush3.bf16.msra.mxu1 %v2671_v46 }
 0x2da   : > { %2377 = vmatprep.subr.bf16.mxu1 %v3285_v0 }
 0x38f   : > { %v1011_v18 = vpop.f32.mrb[4].mxu1 }
 0x390   : > { %v1012_v19 = vadd.f32 %v2138_v17, %v1011_v18  ;;  %v2309_v20 = vpop.f32.mrb[5].mxu1 }
 0x391   : > { %v1014_v21 = vpop.f32.mrb[6].mxu1 }
 0x392   : > { %v1017_v22 = vmax.f32 %v1012_v19, 0.0  ;;  %v2310_v23 = vpop.f32.mrb[7].mxu1  ;;  %v2681_v21 = vld [vmem:[#allocation19] sm:$0xff]  }
 0x393   : > { %v2683_v23 = vld [vmem:[#allocation19 + $0x8] sm:$0xff]  }
 0x394   : > { %v1018_v24 = vpack.c.bf16 %v1017_v22, %v1017_v22 }
 0x396   : > { %v1037_v25 = vsel %vm878_vm1, %v1018_v24, 0  ;;  %v2685_v24 = vld [vmem:[#allocation19 + $0x10] sm:$0xff]  }
 0x397   : > { %2312 = vmatpush3.bf16.msra.mxu0 %v1037_v25  ;;  %v2687_v25 = vld [vmem:[#allocation19 + $0x18] sm:$0xff]  }
 0x398   : > { %2317 = vmatprep.subr.bf16.mxu0 %v3285_v0 }
 0x39a   : > { %2314 = vmatmul.mubr.msk.bf16.vlgmr.msra.gmra.mrb[0].mxu0 %vm874_vm2, %v855_v2 }
 0x39b   : > { %2318 = vmatpush3.bf16.msra.mxu0 %v2656_v26  ;;  %2333 = vmatprep.mubr.msk.bf16.mxu0 %vm3286_vm0, %v3285_v0  ;;  %v2689_v26 = vld [vmem:[#allocation19 + $0x20] sm:$0xff]  }
 0x39c   : > { %2319 = vmatprep.subr.bf16.mxu0 %v3285_v0 }
 0x39f   : > { %2320 = vmatpush3.bf16.msra.mxu0 %v2657_v27  ;;  %v2691_v27 = vld [vmem:[#allocation19 + $0x28] sm:$0xff]  }
 0x3a0   : > { %2321 = vmatprep.subr.bf16.mxu0 %v3285_v0 }
 0x3a3   : > { %2322 = vmatpush3.bf16.msra.mxu0 %v2658_v28  ;;  %v2693_v28 = vld [vmem:[#allocation19 + $0x30] sm:$0xff]  }
 0x3a4   : > { %2323 = vmatprep.subr.bf16.mxu0 %v3285_v0 }
 0x3a7   : > { %2324 = vmatpush3.bf16.msra.mxu0 %v2659_v29  ;;  %v2695_v29 = vld [vmem:[#allocation19 + $0x38] sm:$0xff]  }
 0x3a8   : > { %2325 = vmatprep.subr.bf16.mxu0 %v3285_v0 }
 0x3ab   : > { %2326 = vmatpush3.bf16.msra.mxu0 %v2660_v30  ;;  %v1412_v30 = vld [vmem:[%s853_s23] sm:$0x1]  ;;  %s3140_s23 = sshll.u32 %s3287_s19, 4  ;;  %s3141_s23 = int_to_ptr.vmem [resolvable:$false] %s3140_s23 }
 0x3ac   : > { %2327 = vmatprep.subr.bf16.mxu0 %v3285_v0  ;;  %s3142_s28 = scalar_lea.vmem %s3141_s23, 32  ;;  %p3143_p1 = scmp.lt.s32.totalorder %s1853_s18, %s3141_s23 }
 0x3ad   : > { %p3144_p3 = scmp.lt.s32.totalorder %s3142_s28, %s3136_s8 }
 0x3af   : > { %2328 = vmatpush3.bf16.msra.mxu0 %v2661_v31  ;;  %v2696_v31 = vld [vmem:[#allocation23] sm:$0xff]   ;;  %p3145_p2 = por %p3144_p3, %p3143_p1 }
 0x3b0   : > { %2329 = vmatprep.subr.bf16.mxu0 %v3285_v0 }
 0x3b1   : > { %p3146_p6 = pnand %p3145_p2, %p3139_p13 }
 0x3b3   : > { %2330 = vmatpush3.bf16.msra.mxu0 %v2662_v32  ;;  %v2697_v32 = vld [vmem:[#allocation23 + $0x8] sm:$0xff]  }
 0x3b4   : > { %2331 = vmatprep.subr.bf16.mxu0 %v3285_v0 }
 0x3b7   : > { %2332 = vmatpush3.bf16.msra.mxu0 %v2663_v33  ;;  %v2698_v33 = vld [vmem:[#allocation23 + $0x10] sm:$0xff]  }
 0x3b8   : > { %2357 = vmatprep.subr.bf16.mxu0 %v3285_v0 }
 0x46d   : > { %v1073_v37 = vpop.f32.mrb[0].mxu0 }
 0x46e   : > { %v1079_v38 = vpack.c.bf16 %v1073_v37, %v1073_v37  ;;  %v2315_v39 = vpop.f32.mrb[1].mxu0  ;;  %v1305_v37 = vld [vmem:[#allocation17] sm:$0x1] }
 0x46f   : > { %v1076_v40 = vpop.f32.mrb[2].mxu0 }
 0x470   : > { %v2316_v41 = vpop.f32.mrb[3].mxu0  ;;  %2334 = vmatmul.mubr.bf16.vlgmr.msra.gmra.mrb[4].mxu0 %v1079_v38 }
 0x471   : > { %2373 = vmatprep.mubr.msk.bf16.mxu0 %vm3286_vm0, %v3285_v0  ;;  %2358 = vmatpush3.bf16.msra.mxu0 %v2672_v47 }
 0x472   : > { %2359 = vmatprep.subr.bf16.mxu0 %v3285_v0 }
 0x475   : > { %2360 = vmatpush3.bf16.msra.mxu0 %v2673_v48  ;;  %v2702_v48 = vld [vmem:[#allocation23 + $0x30] sm:$0xff]  }
 0x476   : > { %2361 = vmatprep.subr.bf16.mxu0 %v3285_v0 }
 0x479   : > { %2362 = vmatpush3.bf16.msra.mxu0 %v2674_v49  ;;  %v2703_v49 = vld [vmem:[#allocation23 + $0x38] sm:$0xff]  }
 0x47a   : > { %2363 = vmatprep.subr.bf16.mxu0 %v3285_v0 }
 0x47d   : > { %2364 = vmatpush3.bf16.msra.mxu0 %v2675_v50  ;;  %v2704_v50 = vld [vmem:[%s4157_s7] sm:$0xff]  }
 0x47e   : > { %2365 = vmatprep.subr.bf16.mxu0 %v3285_v0 }
 0x481   : > { %2366 = vmatpush3.bf16.msra.mxu0 %v2676_v51  ;;  %v2705_v51 = vld [vmem:[%s4157_s7 + $0x8] sm:$0xff]  }
 0x482   : > { %2367 = vmatprep.subr.bf16.mxu0 %v3285_v0 }
 0x485   : > { %2368 = vmatpush3.bf16.msra.mxu0 %v2677_v52  ;;  %v2706_v52 = vld [vmem:[%s4157_s7 + $0x10] sm:$0xff]  }
 0x486   : > { %2369 = vmatprep.subr.bf16.mxu0 %v3285_v0 }
 0x489   : > { %2370 = vmatpush3.bf16.msra.mxu0 %v2678_v4  ;;  %v1625_v4 = vld [vmem:[#allocation25] sm:$0x1] }
 0x48a   : > { %2371 = vmatprep.subr.bf16.mxu0 %v3285_v0 }
 0x48d   : > { %2372 = vmatpush3.bf16.msra.mxu0 %v2679_v5 }
 0x48e   : > { %2397 = vmatprep.subr.bf16.mxu0 %v3285_v0 }
 0x543   : > { %v1168_v54 = vpop.f32.mrb[4].mxu0 }
 0x544   : > { %v1169_v55 = vadd.f32 %v2148_v53, %v1168_v54  ;;  %v2335_v56 = vpop.f32.mrb[5].mxu0  ;;  %v2707_v53 = vld [vmem:[%s4157_s7 + $0x18] sm:$0xff]   ;;  %v2708_v54 = vld [vmem:[%s4157_s7 + $0x20] sm:$0xff]  }
 0x545   : > { %v1171_v57 = vpop.f32.mrb[6].mxu0 }
 0x546   : > { %v1174_v58 = vmax.f32 %v1169_v55, 0.0  ;;  %v2336_v59 = vpop.f32.mrb[7].mxu0  ;;  %v2709_v55 = vld [vmem:[%s4157_s7 + $0x28] sm:$0xff]   ;;  %v1605_v57 = vld [vmem:[#allocation22] sm:$0x1] }
 0x548   : > { %v1175_v60 = vrot.slane %v1174_v58, 4 }
 0x54a   : > { %v1176_v61 = vmax.f32 %v1174_v58, %v1175_v60 }
 0x54c   : > { %v1177_v62 = vrot.slane %v1176_v61, 2 }
 0x54e   : > { %v1178_v63 = vmax.f32 %v1176_v61, %v1177_v62 }
 0x550   : > { %v1179_v1 = vrot.slane %v1178_v63, 1 }
 0x552   : > { %v1180_v2 = vmax.f32 %v1178_v63, %v1179_v1 }
 0x554   : > { %v1181_v3 = vpack.c.bf16 %v1180_v2, %v1180_v2  ;;  %v2710_v2 = vld [vmem:[%s4157_s7 + $0x30] sm:$0xff]  }
 0x556   : > { %2354 = vmatmul.mubr.bf16.vlgmr.msra.gmra.mrb[8].mxu1 %v1181_v3  ;;  %v2711_v3 = vld [vmem:[%s4157_s7 + $0x38] sm:$0xff]  }
 0x557   : > { %2393 = vmatprep.mubr.msk.bf16.mxu1 %vm3286_vm0, %v3285_v0  ;;  %2378 = vmatpush3.bf16.msra.mxu1 %v2680_v6 }
 0x558   : > { %2379 = vmatprep.subr.bf16.mxu1 %v3285_v0 }
 0x55b   : > { %2380 = vmatpush3.bf16.msra.mxu1 %v2682_v7 }
 0x55c   : > { %2381 = vmatprep.subr.bf16.mxu1 %v3285_v0 }
 0x55f   : > { %2382 = vmatpush3.bf16.msra.mxu1 %v2684_v8 }
 0x560   : > { %2383 = vmatprep.subr.bf16.mxu1 %v3285_v0 }
 0x563   : > { %2384 = vmatpush3.bf16.msra.mxu1 %v2686_v9 }
 0x564   : > { %2385 = vmatprep.subr.bf16.mxu1 %v3285_v0 }
 0x567   : > { %2386 = vmatpush3.bf16.msra.mxu1 %v2688_v10 }
 0x568   : > { %2387 = vmatprep.subr.bf16.mxu1 %v3285_v0 }
 0x56b   : > { %2388 = vmatpush3.bf16.msra.mxu1 %v2690_v11 }
 0x56c   : > { %2389 = vmatprep.subr.bf16.mxu1 %v3285_v0 }
 0x56f   : > { %2390 = vmatpush3.bf16.msra.mxu1 %v2692_v12 }
 0x570   : > { %2391 = vmatprep.subr.bf16.mxu1 %v3285_v0 }
 0x573   : > { %2392 = vmatpush3.bf16.msra.mxu1 %v2694_v13 }
 0x574   : > { %2417 = vmatprep.subr.bf16.mxu1 %v3285_v0 }
 0x576   : > { %2394 = vmatmul.mubr.bf16.vlgmr.msra.gmra.mrb[12].mxu1 %v1412_v30 }
 0x577   : > { %2433 = vmatprep.mubr.msk.bf16.mxu1 %vm3286_vm0, %v3285_v0  ;;  %2418 = vmatpush3.bf16.msra.mxu1 %v2696_v31 }
 0x578   : > { %2419 = vmatprep.subr.bf16.mxu1 %v3285_v0 }
 0x57b   : > { %2420 = vmatpush3.bf16.msra.mxu1 %v2697_v32 }
 0x57c   : > { %2421 = vmatprep.subr.bf16.mxu1 %v3285_v0 }
 0x57f   : > { %2422 = vmatpush3.bf16.msra.mxu1 %v2698_v33 }
 0x580   : > { %2423 = vmatprep.subr.bf16.mxu1 %v3285_v0 }
 0x583   : > { %2424 = vmatpush3.bf16.msra.mxu1 %v2699_v34 }
 0x584   : > { %2425 = vmatprep.subr.bf16.mxu1 %v3285_v0 }
 0x587   : > { %2426 = vmatpush3.bf16.msra.mxu1 %v2700_v35 }
 0x588   : > { %2427 = vmatprep.subr.bf16.mxu1 %v3285_v0 }
 0x58b   : > { %2428 = vmatpush3.bf16.msra.mxu1 %v2701_v36 }
 0x58c   : > { %2429 = vmatprep.subr.bf16.mxu1 %v3285_v0 }
 0x58f   : > { %2430 = vmatpush3.bf16.msra.mxu1 %v2702_v48 }
 0x590   : > { %2431 = vmatprep.subr.bf16.mxu1 %v3285_v0 }
 0x593   : > { %2432 = vmatpush3.bf16.msra.mxu1 %v2703_v49 }
 0x629   : > { %v1281_v15 = vpop.f32.mrb[8].mxu1 }
 0x62a   : > { %v1282_v16 = vadd.f32 %v1281_v15, %v1198_v14  ;;  %v2355_v17 = vpop.f32.mrb[9].mxu1 }
 0x62b   : > { %v1284_v18 = vpop.f32.mrb[10].mxu1 }
 0x62c   : > { %v1287_v19 = vmax.f32 %v1282_v16, 0.0  ;;  %v2356_v20 = vpop.f32.mrb[11].mxu1 }
 0x62e   : > { %v1288_v22 = vpack.c.bf16 %v1287_v19, %v1287_v19 }
 0x630   : > { %2374 = vmatmul.mubr.bf16.vlgmr.msra.gmra.mrb[8].mxu0 %v1288_v22 }
 0x631   : > { %2398 = vmatpush3.bf16.msra.mxu0 %v2681_v21  ;;  %2413 = vmatprep.mubr.msk.bf16.mxu0 %vm3286_vm0, %v3285_v0 }
 0x632   : > { %2399 = vmatprep.subr.bf16.mxu0 %v3285_v0 }
 0x635   : > { %2400 = vmatpush3.bf16.msra.mxu0 %v2683_v23 }
 0x636   : > { %2401 = vmatprep.subr.bf16.mxu0 %v3285_v0 }
 0x639   : > { %2402 = vmatpush3.bf16.msra.mxu0 %v2685_v24 }
 0x63a   : > { %2403 = vmatprep.subr.bf16.mxu0 %v3285_v0 }
 0x63d   : > { %2404 = vmatpush3.bf16.msra.mxu0 %v2687_v25 }
 0x63e   : > { %2405 = vmatprep.subr.bf16.mxu0 %v3285_v0 }
 0x641   : > { %2406 = vmatpush3.bf16.msra.mxu0 %v2689_v26 }
 0x642   : > { %2407 = vmatprep.subr.bf16.mxu0 %v3285_v0 }
 0x645   : > { %2408 = vmatpush3.bf16.msra.mxu0 %v2691_v27 }
 0x646   : > { %2409 = vmatprep.subr.bf16.mxu0 %v3285_v0 }
 0x649   : > { %2410 = vmatpush3.bf16.msra.mxu0 %v2693_v28  ;;  %v1511_v44 = vpop.f32.mrb[12].mxu1 }
 0x64a   : > { %2411 = vmatprep.subr.bf16.mxu0 %v3285_v0  ;;  %v2395_v45 = vpop.f32.mrb[13].mxu1 }
 0x64b   : > { %v1514_v46 = vpop.f32.mrb[14].mxu1 }
 0x64c   : > { %v2396_v47 = vpop.f32.mrb[15].mxu1 }
 0x64d   : > { %2412 = vmatpush3.bf16.msra.mxu0 %v2695_v29 }
 0x64e   : > { %2437 = vmatprep.subr.bf16.mxu0 %v3285_v0 }
 0x703   : > { %v1388_v38 = vpop.f32.mrb[8].mxu0 }
 0x704   : > { %v1389_v39 = vadd.f32 %v1388_v38, %v1305_v37  ;;  %v2375_v40 = vpop.f32.mrb[9].mxu0 }
 0x705   : > { %v1391_v41 = vpop.f32.mrb[10].mxu0 }
 0x706   : > { %1394 = vst [vmem:[%s850_s25] sm:$0x1] %v1389_v39  ;;  %v1395_v42 = vpack.c.bf16 %v1389_v39, %v1389_v39  ;;  %v2376_v43 = vpop.f32.mrb[11].mxu0 }
 0x708   : > { %2414 = vmatmul.mubr.bf16.vlgmr.msra.gmra.mrb[12].mxu0 %v1395_v42 }
 0x709   : > { %2453 = vmatprep.mubr.msk.bf16.mxu0 %vm3286_vm0, %v3285_v0  ;;  %2438 = vmatpush3.bf16.msra.mxu0 %v2704_v50 }
 0x70a   : > { %2439 = vmatprep.subr.bf16.mxu0 %v3285_v0 }
 0x70d   : > { %2440 = vmatpush3.bf16.msra.mxu0 %v2705_v51 }
 0x70e   : > { %2441 = vmatprep.subr.bf16.mxu0 %v3285_v0 }
 0x711   : > { %2442 = vmatpush3.bf16.msra.mxu0 %v2706_v52 }
 0x712   : > { %2443 = vmatprep.subr.bf16.mxu0 %v3285_v0 }
 0x715   : > { %2444 = vmatpush3.bf16.msra.mxu0 %v2707_v53 }
 0x716   : > { %2445 = vmatprep.subr.bf16.mxu0 %v3285_v0 }
 0x719   : > { %2446 = vmatpush3.bf16.msra.mxu0 %v2708_v54 }
 0x71a   : > { %2447 = vmatprep.subr.bf16.mxu0 %v3285_v0 }
 0x71d   : > { %2448 = vmatpush3.bf16.msra.mxu0 %v2709_v55 }
 0x71e   : > { %2449 = vmatprep.subr.bf16.mxu0 %v3285_v0 }
 0x721   : > { %2450 = vmatpush3.bf16.msra.mxu0 %v2710_v2 }
 0x722   : > { %2451 = vmatprep.subr.bf16.mxu0 %v3285_v0 }
 0x725   : > { %2452 = vmatpush3.bf16.msra.mxu0 %v2711_v3 }
 0x7db   : > { %v1599_v56 = vpop.f32.mrb[12].mxu0 }
 0x7dc   : > { %v1600_v58 = vadd.f32 %v1599_v56, %v1511_v44  ;;  %v2415_v59 = vpop.f32.mrb[13].mxu0 }
 0x7dd   : > { %v1602_v60 = vpop.f32.mrb[14].mxu0 }
 0x7de   : > { %v1606_v61 = vadd.f32 %v1605_v57, %v1600_v58  ;;  %v2416_v62 = vpop.f32.mrb[15].mxu0 }
 0x7e0   : > { %v1607_v63 = vmax.f32 %v1606_v61, 0.0 }
 0x7e2   : > { %v1608_v1 = vpack.c.bf16 %v1607_v63, %v1607_v63 }
 0x7e4   : > { %2434 = vmatmul.mubr.bf16.vlgmr.msra.gmra.mrb[16].mxu1 %v1608_v1 }
 0x8b7   : > { %v1708_v5 = vpop.f32.mrb[16].mxu1 }
 0x8b8   : > { %v1709_v6 = vadd.f32 %v1708_v5, %v1625_v4  ;;  %v2435_v7 = vpop.f32.mrb[17].mxu1 }
 0x8b9   : > { %v1711_v8 = vpop.f32.mrb[18].mxu1 }
 0x8ba   : > { %v1714_v9 = vmax.f32 %v1709_v6, 0.0  ;;  %v2436_v10 = vpop.f32.mrb[19].mxu1 }
 0x8bc   : > { %v1715_v11 = vpack.c.bf16 %v1714_v9, %v1714_v9 }
 0x8be   : > { %2454 = vmatmul.mubr.bf16.vlgmr.msra.gmra.mrb[16].mxu0 %v1715_v11 }
 0x8bf   : > { %3149 = shalt.err (!%p3146_p6)
}
 0x8c0   : > { %s3150_s25 = scalar_lea.hbm %s3985_s17, 16  ;;  %s3154_s6 = scalar_lea.hbm %s4158_s9, 32 }
 0x8c1   : > { %p3151_p10 = scmp.ne.s32.totalorder %s3985_s17, %s3150_s25  ;;  %p3155_p0 = scmp.lt.u32.totalorder %s3985_s17, %s4158_s9 }
 0x8c2   : > { %p3156_p7 = scmp.lt.u32.totalorder %s3154_s6, %s3150_s25  ;;  %p3158_p8 = scmp.lt.u32.totalorder %s3150_s25, %s3985_s17 }
 0x8c3   : > { %p3152_p5 = pnand %p3151_p10, %p4159_p4 }
 0x8c4   : > { %p3157_p11 = por %p3156_p7, %p3155_p0 }
 0x8c5   : > { %p3153_p9 = pneg %p3152_p5 }
 0x8c6   : > { %p3159_p12 = por %p3158_p8, %p3157_p11 }
 0x8c8   : > { %p3160_p13 = pnand %p3159_p12, %p3153_p9 }
 0x8ca   : > { %3163 = shalt.err (!%p3160_p13)
}
 0x8cb   : > { %2514 = dma.vmem_to_hbm [thread:$0]  (%p4159_p4), %s1853_s18, 16, %s3985_s17, %s1827_s22  }
 0x8cc   : > { %s4160_s28 = sld [smem:[#allocation55_spill]]  ;;  %s844_s5 = scalar_lea.vmem [#allocation26], %s3813_s26 }
 0x8cd   : > { %s1839_s24 = sshll.u32 %s844_s5, 4  ;;  %s4161_s1 = sld [smem:[#allocation56_spill]]  ;;  %s4018_s24 = int_to_ptr.vmem [resolvable:$true] %s1839_s24 }
 0x8ce   : > { %s1823_s17 = scalar_lea.sflag [#allocation4], %s3813_s26  ;;  %s3164_s18 = scalar_lea.vmem %s4018_s24, 16 }
 0x8cf   : > { %p3165_p1 = scmp.ne.s32.totalorder %s4018_s24, %s3164_s18  ;;  %s3288_s2 = smov [#allocation26]  }
 0x8d0   : > { %s3168_s22 = sshll.u32 %s3288_s2, 4  ;;  %s3169_s22 = int_to_ptr.vmem [resolvable:$false] %s3168_s22 }
 0x8d1   : > { %p3166_p3 = pnand %p3165_p1, %p4159_p4  ;;  %s3170_s8 = scalar_lea.vmem %s3169_s22, 32 }
 0x8d2   : > { %v1732_v0 = vld [vmem:[%s4160_s28] sm:$0x1]  ;;  %p3171_p6 = scmp.lt.s32.totalorder %s4018_s24, %s3169_s22  ;;  %p3172_p10 = scmp.lt.s32.totalorder %s3170_s8, %s3164_s18 }
 0x8d3   : > { %s4016_s19 = scalar_lea.hbm %s4161_s1, %s2205_s30  ;;  %p3167_p2 = pneg %p3166_p3 }
 0x8d4   : > { %p3173_p5 = por %p3172_p10, %p3171_p6 }
 0x8d6   : > { %p3174_p9 = pnand %p3173_p5, %p3167_p2 }
 0x991   : > { %v1815_v12 = vpop.f32.mrb[16].mxu0 }
 0x992   : > { %v1816_v13 = vadd.f32 %v1815_v12, %v1732_v0  ;;  %v2455_v14 = vpop.f32.mrb[17].mxu0 }
 0x993   : > { %v1818_v15 = vpop.f32.mrb[18].mxu0 }
 0x994   : > { %1821 = vst [vmem:[%s844_s5] sm:$0x1] %v1816_v13  ;;  %v2456_v16 = vpop.f32.mrb[19].mxu0 }
 0x995   : > { %3177 = shalt.err (!%p3174_p9)
}
 0x996   : > { %s3178_s26 = scalar_lea.hbm %s4016_s19, 16  ;;  %s3182_s28 = scalar_lea.hbm %s4161_s1, 32 }
 0x997   : > { %p3179_p0 = scmp.ne.s32.totalorder %s4016_s19, %s3178_s26  ;;  %p3183_p8 = scmp.lt.u32.totalorder %s4016_s19, %s4161_s1 }
 0x998   : > { %p3184_p12 = scmp.lt.u32.totalorder %s3182_s28, %s3178_s26  ;;  %p3186_p1 = scmp.lt.u32.totalorder %s3178_s26, %s4016_s19 }
 0x999   : > { %p3180_p7 = pnand %p3179_p0, %p4159_p4 }
 0x99a   : > { %p3185_p13 = por %p3184_p12, %p3183_p8 }
 0x99b   : > { %p3181_p11 = pneg %p3180_p7 }
 0x99c   : > { %p3187_p3 = por %p3186_p1, %p3185_p13 }
 0x99e   : > { %p3188_p2 = pnand %p3187_p3, %p3181_p11 }
 0x9a0   : > { %3191 = shalt.err (!%p3188_p2)
}
 0x9a1   : > { %2513 = dma.vmem_to_hbm [thread:$0]  (%p4159_p4), %s4018_s24, 16, %s4016_s19, %s1823_s17  }
 0x9a2 PF: > { %s4162_s6 = sld [smem:[#allocation40_spill]]  ;;  %p4163_p6 = scmp.ne.s32.totalorder %s4133_s29, 0 }
 0x9a3   : > { %p4164_p10 = scmp.ge.s32.totalorder %s3266_s21, 2 }
 0x9a5   : > { %p2565_p5 = pnand %p4164_p10, %p4163_p6 }
 0x9a8   : > { %s1864_s18 = sand.u32 1, %s4162_s6  }
 0x9a9   : > { %s1865_s2 = scalar_lea.sflag [#allocation4], %s1864_s18 }
 0x9aa   : > { %3245 = dma.done.wait (!%p2565_p5), %s1865_s2, 16  }
 0x9ab   : > { %3247 = vsyncadd (!%p2565_p5), %s1865_s2, 4294967280  ;;  %s1873_s22 = scalar_lea.sflag [#allocation28], %s1864_s18 }
 0x9ac   : > { %3249 = dma.done.wait (!%p2565_p5), %s1873_s22, 16  }
 0x9ad   : > { %3251 = vsyncadd (!%p2565_p5), %s1873_s22, 4294967280  ;;  %s4165_s0 = sld [smem:[#allocation41_spill]]  ;;  %p45_p4 = scmp.ge.s32.totalorder %s3714_s3, 4  }
 0x9ae   : > { %s4166_s30 = smov %s3262_s20  ;;  %s4167_s20 = smov %s3726_s27 }
 0x9af   : > { %s4168_s21 = smov %s3714_s3  ;;  %47 = sbr.rel (!%p45_p4) target bundleno = 30 (0x1e), region = 222 }
 0x9b6   :  { %1877 = vsyncpa [#allocation3], 1 }
 0x9b7   :  { %1879 = vsyncpa [#allocation3 + $0x1], 1 }
 0x9b8   :  { %1880 = vsyncpa [#allocation6], 1 }
 0x9b9   :  { %1882 = vsyncpa [#allocation6 + $0x1], 1 }
 0x9ba   :  { %1883 = vsyncpa [#allocation9], 1 }
 0x9bb   :  { %1884 = vsyncpa [#allocation12], 1 }
 0x9bc   :  { %1885 = vsyncpa [#allocation15], 1 }
 0x9bd   :  { %1886 = vsyncpa [#allocation18], 1 }
 0x9be   :  { %1887 = vsyncpa [#allocation21], 1 }
 0x9bf   :  { %1888 = vsyncpa [#allocation24], 1 }
 0x9c0   :  { %1889 = vsyncpa [#allocation4], 1 }
 0x9c1   :  { %1891 = vsyncpa [#allocation4 + $0x1], 1 }
 0x9c2   :  { %1892 = vsyncpa [#allocation28], 1 }
 0x9c3   :  { %1894 = vsyncpa [#allocation28 + $0x1], 1 }

</bundles_post_ra>
